<compile_context>
chip_gen: v5e
topology: v5e:2x2
jax: 0.10.0
libtpu: 0.0.40
codegen_flags: <defaults>
</compile_context>

<pallas_src>
import jax
import jax.numpy as jnp
from jax import lax
from jax.experimental import pallas as pl
from jax.experimental.pallas import tpu as pltpu


# ----------------------------------------------------------------------------
# Pallas kernel: fused branch2 (1x1 conv+BN+ReLU -> dw3x3+BN -> 1x1 conv+BN+ReLU)
# ----------------------------------------------------------------------------
def _make_branch2_kernel(h, w_true, w_pad):
    def kernel(x_ref, w1_ref, b1_ref, wdw_ref, w2_ref, b2_ref, o_ref, pad_ref):
        nb = x_ref.shape[0]
        c = x_ref.shape[3]
        rows = nb * h * w_pad

        # ---- 1x1 conv (+ folded BN) + ReLU --------------------------------
        x = x_ref[...].astype(jnp.float32).reshape(rows, c)
        y = jnp.dot(x, w1_ref[...], preferred_element_type=jnp.float32)
        y = jnp.maximum(y + b1_ref[...], 0.0)

        # ---- depthwise 3x3 (stride 1, pad 1) (+ folded BN scale) -----------
        # Stage y into a zero-bordered VMEM scratch; the nine taps become
        # plain offset loads, so no masking or cross-lane shuffles are needed.
        pad_ref[:, 1:h + 1, 1:w_pad + 1, :] = y.reshape(nb, h, w_pad, c)
        # Zero the borders every step (scratch is per-core under megacore grid
        # partitioning, so a "first step only" init would be unsafe).  The
        # right-hand store also re-zeroes the wrapper's W-padding columns,
        # which hold relu(b1) after the pointwise conv but must act as conv
        # zero padding.
        pad_ref[:, 0:1, :, :] = jnp.zeros((nb, 1, w_pad + 2, c), jnp.float32)
        pad_ref[:, h + 1:h + 2, :, :] = jnp.zeros((nb, 1, w_pad + 2, c),
                                                  jnp.float32)
        pad_ref[:, :, 0:1, :] = jnp.zeros((nb, h + 2, 1, c), jnp.float32)
        pad_ref[:, :, w_true + 1:w_pad + 2, :] = jnp.zeros(
            (nb, h + 2, w_pad + 1 - w_true, c), jnp.float32)

        wdw = wdw_ref[...]                                   # (9, 1, C)
        acc = jnp.zeros((nb, h, w_pad, c), jnp.float32)
        for ky in range(3):
            for kx in range(3):
                tap = pad_ref[:, ky:ky + h, kx:kx + w_pad, :]
                acc = acc + tap * wdw[3 * ky + kx]

        # ---- 1x1 conv (+ folded BN, + folded dw-BN bias) + ReLU -------------
        o = jnp.dot(acc.reshape(rows, c), w2_ref[...],
                    preferred_element_type=jnp.float32)
        o = jnp.maximum(o + b2_ref[...], 0.0)
        o_ref[...] = o.reshape(nb, h, w_pad, c).astype(o_ref.dtype)

    return kernel


def _branch2_pallas(x2_nhwc, w1t, b1, wdw9, w2t, b2,
                    *, block_vmem_budget_bytes=16 * 1024 * 1024):
    """branch2 on NHWC input (N, H, W, C) -> NHWC output of the same shape."""
    n, h, w, c = x2_nhwc.shape

    # Pad W up to a sublane multiple so in-kernel reshapes stay free; the
    # padded columns are re-zeroed inside the kernel so they behave exactly
    # like the conv's zero padding, and they are sliced off afterwards.
    w_pad = ((w + 7) // 8) * 8
    if w_pad != w:
        x2_nhwc = jnp.pad(x2_nhwc, ((0, 0), (0, 0), (0, w_pad - w), (0, 0)))

    # Images per grid step: as many as the VMEM budget allows, while keeping
    # >= 2 grid steps when N > 1 so both v7x cores get work.  The estimate
    # uses the lane-padded channel count (vregs are 128 lanes wide) and
    # accounts for double-buffered in/out blocks, a few live f32
    # intermediates, and the zero-bordered scratch.
    c_pad = ((c + 127) // 128) * 128
    wb_pad = (((w_pad + 2) + 7) // 8) * 8
    per_image = 4 * c_pad * (8 * h * w_pad + (h + 2) * wb_pad)
    cap = max(1, block_vmem_budget_bytes // max(per_image, 1))
    divisors = [d for d in range(1, n + 1) if n % d == 0 and d <= cap]
    multi_step = [d for d in divisors if n // d >= 2]
    nb = max(multi_step) if multi_step else max(divisors)
    grid = (n // nb,)

    kernel = _make_branch2_kernel(h, w, w_pad)
    out = pl.pallas_call(
        kernel,
        out_shape=jax.ShapeDtypeStruct((n, h, w_pad, c), x2_nhwc.dtype),
        grid_spec=pltpu.PrefetchScalarGridSpec(
            num_scalar_prefetch=0,
            grid=grid,
            in_specs=[
                pl.BlockSpec((nb, h, w_pad, c), lambda i: (i, 0, 0, 0)),  # x2
                pl.BlockSpec((c, c), lambda i: (0, 0)),        # w1 (folded, T)
                pl.BlockSpec((1, c), lambda i: (0, 0)),        # b1
                pl.BlockSpec((9, 1, c), lambda i: (0, 0, 0)),  # dw weights
                pl.BlockSpec((c, c), lambda i: (0, 0)),        # w2 (folded, T)
                pl.BlockSpec((1, c), lambda i: (0, 0)),        # b2 (+dw bias)
            ],
            out_specs=pl.BlockSpec((nb, h, w_pad, c), lambda i: (i, 0, 0, 0)),
            scratch_shapes=[
                pltpu.VMEM((nb, h + 2, w_pad + 2, c), jnp.float32),
            ],
        ),
        compiler_params=pltpu.CompilerParams(
            dimension_semantics=("parallel",),
            # above the 16/32 MiB scoped defaults, below v7x's 64 MiB physical
            vmem_limit_bytes=48 * 1024 * 1024,
        ),
    )(x2_nhwc, w1t, b1, wdw9, w2t, b2)

    if w_pad != w:
        out = out[:, :, :w, :]
    return out


# ----------------------------------------------------------------------------
# Wrapper: full Shuffle_Block forward (stride == 1)
# ----------------------------------------------------------------------------
def channel_shuffle_jax(x, groups):
    n, c, h, w = x.shape
    x = x.reshape(n, groups, c // groups, h, w)
    x = jnp.transpose(x, (0, 2, 1, 3, 4))
    return x.reshape(n, c, h, w)


def shuffle_block_stride1(x_nchw, folded_params):
    """Shuffle_Block.forward for stride == 1 (inp == oup, no branch1)."""
    # TODO(synk): stride > 1 path (branch1 + strided depthwise conv) is not
    # implemented as a Pallas kernel here.
    w1t, b1, wdw9, w2t, b2 = folded_params
    n, c, h, w = x_nchw.shape
    bf = c // 2
    x1 = x_nchw[:, :bf]
    x2 = x_nchw[:, bf:]
    x2_nhwc = jnp.transpose(x2, (0, 2, 3, 1))
    y2_nhwc = _branch2_pallas(x2_nhwc, w1t, b1, wdw9, w2t, b2)
    y2 = jnp.transpose(y2_nhwc, (0, 3, 1, 2))
    out = jnp.concatenate([x1, y2], axis=1)
    return channel_shuffle_jax(out, 2)


# ----------------------------------------------------------------------------
# Parameter folding (eval-mode BatchNorm folded into the convs)
# ----------------------------------------------------------------------------
def _bn_scale_bias(gamma, beta, mean, var, eps=1e-5):
    s = gamma / jnp.sqrt(var + eps)
    return s, beta - mean * s


def fold_shuffle_block_params(w1, bn1, wd, bn2, w2, bn3, eps=1e-5):
    """w1, w2: (C, C) 1x1 conv weights; wd: (C, 1, 3, 3) depthwise weight."""
    s1, t1 = _bn_scale_bias(*bn1, eps=eps)
    s2, t2 = _bn_scale_bias(*bn2, eps=eps)
    s3, t3 = _bn_scale_bias(*bn3, eps=eps)
    w1t = (w1 * s1[:, None]).T                      # (Cin, Cout) for x @ w
    b1 = t1[None, :]                                # (1, C)
    wdw = wd[:, 0] * s2[:, None, None]              # (C, 3, 3)
    wdw9 = jnp.transpose(wdw, (1, 2, 0)).reshape(9, 1, -1)   # k = 3*ky + kx
    w2t = (w2 * s3[:, None]).T
    # Fold the depthwise-BN bias through the second pointwise conv:
    #   relu((dw(y) + t2) @ W2t + t3) == relu(dw(y) @ W2t + (t2 @ W2t + t3))
    b2 = t3[None, :] + t2[None, :] @ w2t            # (1, C)
    return w1t, b1, wdw9, w2t, b2


# ----------------------------------------------------------------------------
# Pure-JAX reference (unfused, mirrors the PyTorch module in eval mode)
# ----------------------------------------------------------------------------
def _conv1x1_nchw(x, w):
    return lax.conv_general_dilated(
        x, w[:, :, None, None], window_strides=(1, 1), padding="VALID",
        dimension_numbers=("NCHW", "OIHW", "NCHW"))


def _dwconv3x3_nchw(x, w):
    c = x.shape[1]
    return lax.conv_general_dilated(
        x, w, window_strides=(1, 1), padding=((1, 1), (1, 1)),
        dimension_numbers=("NCHW", "OIHW", "NCHW"), feature_group_count=c)


def _bn_nchw(x, gamma, beta, mean, var, eps=1e-5):
    s = gamma / jnp.sqrt(var + eps)
    return x * s[None, :, None, None] + (beta - mean * s)[None, :, None, None]


def shuffle_block_stride1_reference(x, w1, bn1, wd, bn2, w2, bn3):
    bf = x.shape[1] // 2
    x1, x2 = x[:, :bf], x[:, bf:]
    y = jax.nn.relu(_bn_nchw(_conv1x1_nchw(x2, w1), *bn1))
    y = _bn_nchw(_dwconv3x3_nchw(y, wd), *bn2)
    y = jax.nn.relu(_bn_nchw(_conv1x1_nchw(y, w2), *bn3))
    out = jnp.concatenate([x1, y], axis=1)
    return channel_shuffle_jax(out, 2)


# ----------------------------------------------------------------------------
if __name__ == "__main__":
    key = jax.random.PRNGKey(0)
    ks = jax.random.split(key, 8)

    # stride == 1 Shuffle_Block requires inp == oup == 2 * branch_features
    N, C, H, W = 2, 8, 16, 16
    bf = C // 2

    x = jax.random.normal(ks[0], (N, C, H, W), dtype=jnp.float32)

    def bn_params(k):
        k1, k2, k3, k4 = jax.random.split(k, 4)
        gamma = 1.0 + 0.1 * jax.random.normal(k1, (bf,), jnp.float32)
        beta = 0.1 * jax.random.normal(k2, (bf,), jnp.float32)
        mean = 0.1 * jax.random.normal(k3, (bf,), jnp.float32)
        var = 0.5 + jax.random.uniform(k4, (bf,), jnp.float32)
        return gamma, beta, mean, var

    w1 = 0.3 * jax.random.normal(ks[1], (bf, bf), jnp.float32)
    wd = 0.3 * jax.random.normal(ks[2], (bf, 1, 3, 3), jnp.float32)
    w2 = 0.3 * jax.random.normal(ks[3], (bf, bf), jnp.float32)
    bn1, bn2, bn3 = bn_params(ks[4]), bn_params(ks[5]), bn_params(ks[6])

    folded = fold_shuffle_block_params(w1, bn1, wd, bn2, w2, bn3)
    out = shuffle_block_stride1(x, folded)
    out = jax.block_until_ready(out)

    ref = shuffle_block_stride1_reference(x, w1, bn1, wd, bn2, w2, bn3)
    assert out.shape == (N, C, H, W)
    max_err = float(jnp.max(jnp.abs(out - ref)))
    assert jnp.allclose(out, ref, atol=3e-2, rtol=3e-2), max_err

    print("KERNEL_OK")
</pallas_src>

<mosaic_0001>
module attributes {stable_mosaic.version = 11 : i64} {
  func.func @kernel(%arg0: i32, %arg1: memref<1x16x16x4xf32, #tpu.memory_space<vmem>>, %arg2: memref<4x4xf32, #tpu.memory_space<vmem>>, %arg3: memref<1x4xf32, #tpu.memory_space<vmem>>, %arg4: memref<9x1x4xf32, #tpu.memory_space<vmem>>, %arg5: memref<4x4xf32, #tpu.memory_space<vmem>>, %arg6: memref<1x4xf32, #tpu.memory_space<vmem>>, %arg7: memref<1x16x16x4xf32, #tpu.memory_space<vmem>>, %arg8: memref<1x18x18x4xf32, #tpu.memory_space<vmem>>) attributes {dimension_semantics = [#tpu.dimension_semantics<parallel>], iteration_bounds = array<i64: 2>, scalar_prefetch = 0 : i64, scratch_operands = 1 : i64, tpu.core_type = #tpu.core_type<tc>, window_params = [{transform_indices = @transform_0, window_bounds = array<i64: 1, 16, 16, 4>}, {pipeline_mode = #tpu.pipeline_mode<synchronous>, transform_indices = @transform_1, window_bounds = array<i64: 4, 4>}, {pipeline_mode = #tpu.pipeline_mode<synchronous>, transform_indices = @transform_2, window_bounds = array<i64: 1, 4>}, {pipeline_mode = #tpu.pipeline_mode<synchronous>, transform_indices = @transform_3, window_bounds = array<i64: 9, 1, 4>}, {pipeline_mode = #tpu.pipeline_mode<synchronous>, transform_indices = @transform_4, window_bounds = array<i64: 4, 4>}, {pipeline_mode = #tpu.pipeline_mode<synchronous>, transform_indices = @transform_5, window_bounds = array<i64: 1, 4>}, {transform_indices = @transform_6, window_bounds = array<i64: 1, 16, 16, 4>}]} {
    %c0 = arith.constant 0 : index
    %c0_0 = arith.constant 0 : index
    %c0_1 = arith.constant 0 : index
    %c0_2 = arith.constant 0 : index
    %0 = vector.load %arg1[%c0, %c0_0, %c0_1, %c0_2] : memref<1x16x16x4xf32, #tpu.memory_space<vmem>>, vector<1x16x16x4xf32>
    %1 = vector.shape_cast %0 : vector<1x16x16x4xf32> to vector<256x4xf32>
    %c0_3 = arith.constant 0 : index
    %c0_4 = arith.constant 0 : index
    %2 = vector.load %arg2[%c0_3, %c0_4] : memref<4x4xf32, #tpu.memory_space<vmem>>, vector<4x4xf32>
    %cst = arith.constant dense<0.000000e+00> : vector<256x4xf32>
    %3 = tpu.matmul %1, %2, %cst {dimension_numbers = #tpu.dot_dimension_numbers<[1], [0], [0], [1], [0, 0, 1, 1], [], []>} : vector<256x4xf32>, vector<4x4xf32>, vector<256x4xf32> -> vector<256x4xf32>
    %c0_5 = arith.constant 0 : index
    %c0_6 = arith.constant 0 : index
    %4 = vector.load %arg3[%c0_5, %c0_6] : memref<1x4xf32, #tpu.memory_space<vmem>>, vector<1x4xf32>
    %5 = vector.broadcast %4 : vector<1x4xf32> to vector<256x4xf32>
    %6 = arith.addf %3, %5 : vector<256x4xf32>
    %cst_7 = arith.constant 0.000000e+00 : f32
    %7 = vector.broadcast %cst_7 : f32 to vector<256x4xf32>
    %8 = arith.maximumf %6, %7 : vector<256x4xf32>
    %9 = vector.shape_cast %8 : vector<256x4xf32> to vector<1x16x16x4xf32>
    %c0_8 = arith.constant 0 : index
    %c1 = arith.constant 1 : index
    %c1_9 = arith.constant 1 : index
    %c0_10 = arith.constant 0 : index
    %10 = vector.load %arg8[%c0_8, %c1, %c1_9, %c0_10] : memref<1x18x18x4xf32, #tpu.memory_space<vmem>>, vector<1x16x16x4xf32>
    tpu.vector_store %arg8[%c0_8, %c1, %c1_9, %c0_10], %9 {strides = array<i32>} : memref<1x18x18x4xf32, #tpu.memory_space<vmem>>, vector<1x16x16x4xf32>,
    %cst_11 = arith.constant 0.000000e+00 : f32
    %11 = vector.broadcast %cst_11 : f32 to vector<1x1x18x4xf32>
    %c0_12 = arith.constant 0 : index
    %c0_13 = arith.constant 0 : index
    %c0_14 = arith.constant 0 : index
    %c0_15 = arith.constant 0 : index
    %12 = vector.load %arg8[%c0_12, %c0_13, %c0_14, %c0_15] : memref<1x18x18x4xf32, #tpu.memory_space<vmem>>, vector<1x1x18x4xf32>
    tpu.vector_store %arg8[%c0_12, %c0_13, %c0_14, %c0_15], %11 {strides = array<i32>} : memref<1x18x18x4xf32, #tpu.memory_space<vmem>>, vector<1x1x18x4xf32>,
    %cst_16 = arith.constant 0.000000e+00 : f32
    %13 = vector.broadcast %cst_16 : f32 to vector<1x1x18x4xf32>
    %c0_17 = arith.constant 0 : index
    %c17 = arith.constant 17 : index
    %c0_18 = arith.constant 0 : index
    %c0_19 = arith.constant 0 : index
    %14 = vector.load %arg8[%c0_17, %c17, %c0_18, %c0_19] : memref<1x18x18x4xf32, #tpu.memory_space<vmem>>, vector<1x1x18x4xf32>
    tpu.vector_store %arg8[%c0_17, %c17, %c0_18, %c0_19], %13 {strides = array<i32>} : memref<1x18x18x4xf32, #tpu.memory_space<vmem>>, vector<1x1x18x4xf32>,
    %cst_20 = arith.constant 0.000000e+00 : f32
    %15 = vector.broadcast %cst_20 : f32 to vector<1x18x1x4xf32>
    %c0_21 = arith.constant 0 : index
    %c0_22 = arith.constant 0 : index
    %c0_23 = arith.constant 0 : index
    %c0_24 = arith.constant 0 : index
    %16 = vector.load %arg8[%c0_21, %c0_22, %c0_23, %c0_24] : memref<1x18x18x4xf32, #tpu.memory_space<vmem>>, vector<1x18x1x4xf32>
    tpu.vector_store %arg8[%c0_21, %c0_22, %c0_23, %c0_24], %15 {strides = array<i32>} : memref<1x18x18x4xf32, #tpu.memory_space<vmem>>, vector<1x18x1x4xf32>,
    %cst_25 = arith.constant 0.000000e+00 : f32
    %17 = vector.broadcast %cst_25 : f32 to vector<1x18x1x4xf32>
    %c0_26 = arith.constant 0 : index
    %c0_27 = arith.constant 0 : index
    %c17_28 = arith.constant 17 : index
    %c0_29 = arith.constant 0 : index
    %18 = vector.load %arg8[%c0_26, %c0_27, %c17_28, %c0_29] : memref<1x18x18x4xf32, #tpu.memory_space<vmem>>, vector<1x18x1x4xf32>
    tpu.vector_store %arg8[%c0_26, %c0_27, %c17_28, %c0_29], %17 {strides = array<i32>} : memref<1x18x18x4xf32, #tpu.memory_space<vmem>>, vector<1x18x1x4xf32>,
    %c0_30 = arith.constant 0 : index
    %c0_31 = arith.constant 0 : index
    %c0_32 = arith.constant 0 : index
    %19 = vector.load %arg4[%c0_30, %c0_31, %c0_32] : memref<9x1x4xf32, #tpu.memory_space<vmem>>, vector<9x1x4xf32>
    %cst_33 = arith.constant 0.000000e+00 : f32
    %20 = vector.broadcast %cst_33 : f32 to vector<1x16x16x4xf32>
    %c0_34 = arith.constant 0 : index
    %c0_35 = arith.constant 0 : index
    %c0_36 = arith.constant 0 : index
    %c0_37 = arith.constant 0 : index
    %21 = vector.load %arg8[%c0_34, %c0_35, %c0_36, %c0_37] : memref<1x18x18x4xf32, #tpu.memory_space<vmem>>, vector<1x16x16x4xf32>
    %22 = vector.extract_strided_slice %19 {offsets = [0, 0, 0], sizes = [1, 1, 4], strides = [1, 1, 1]} : vector<9x1x4xf32> to vector<1x1x4xf32>
    %23 = vector.shape_cast %22 : vector<1x1x4xf32> to vector<1x4xf32>
    %24 = vector.shape_cast %23 : vector<1x4xf32> to vector<1x1x1x4xf32>
    %25 = vector.broadcast %24 : vector<1x1x1x4xf32> to vector<1x16x16x4xf32>
    %26 = arith.mulf %21, %25 : vector<1x16x16x4xf32>
    %27 = arith.addf %20, %26 : vector<1x16x16x4xf32>
    %c0_38 = arith.constant 0 : index
    %c0_39 = arith.constant 0 : index
    %c1_40 = arith.constant 1 : index
    %c0_41 = arith.constant 0 : index
    %28 = vector.load %arg8[%c0_38, %c0_39, %c1_40, %c0_41] : memref<1x18x18x4xf32, #tpu.memory_space<vmem>>, vector<1x16x16x4xf32>
    %29 = vector.extract_strided_slice %19 {offsets = [1, 0, 0], sizes = [1, 1, 4], strides = [1, 1, 1]} : vector<9x1x4xf32> to vector<1x1x4xf32>
    %30 = vector.shape_cast %29 : vector<1x1x4xf32> to vector<1x4xf32>
    %31 = vector.shape_cast %30 : vector<1x4xf32> to vector<1x1x1x4xf32>
    %32 = vector.broadcast %31 : vector<1x1x1x4xf32> to vector<1x16x16x4xf32>
    %33 = arith.mulf %28, %32 : vector<1x16x16x4xf32>
    %34 = arith.addf %27, %33 : vector<1x16x16x4xf32>
    %c0_42 = arith.constant 0 : index
    %c0_43 = arith.constant 0 : index
    %c2 = arith.constant 2 : index
    %c0_44 = arith.constant 0 : index
    %35 = vector.load %arg8[%c0_42, %c0_43, %c2, %c0_44] : memref<1x18x18x4xf32, #tpu.memory_space<vmem>>, vector<1x16x16x4xf32>
    %36 = vector.extract_strided_slice %19 {offsets = [2, 0, 0], sizes = [1, 1, 4], strides = [1, 1, 1]} : vector<9x1x4xf32> to vector<1x1x4xf32>
    %37 = vector.shape_cast %36 : vector<1x1x4xf32> to vector<1x4xf32>
    %38 = vector.shape_cast %37 : vector<1x4xf32> to vector<1x1x1x4xf32>
    %39 = vector.broadcast %38 : vector<1x1x1x4xf32> to vector<1x16x16x4xf32>
    %40 = arith.mulf %35, %39 : vector<1x16x16x4xf32>
    %41 = arith.addf %34, %40 : vector<1x16x16x4xf32>
    %c0_45 = arith.constant 0 : index
    %c1_46 = arith.constant 1 : index
    %c0_47 = arith.constant 0 : index
    %c0_48 = arith.constant 0 : index
    %42 = vector.load %arg8[%c0_45, %c1_46, %c0_47, %c0_48] : memref<1x18x18x4xf32, #tpu.memory_space<vmem>>, vector<1x16x16x4xf32>
    %43 = vector.extract_strided_slice %19 {offsets = [3, 0, 0], sizes = [1, 1, 4], strides = [1, 1, 1]} : vector<9x1x4xf32> to vector<1x1x4xf32>
    %44 = vector.shape_cast %43 : vector<1x1x4xf32> to vector<1x4xf32>
    %45 = vector.shape_cast %44 : vector<1x4xf32> to vector<1x1x1x4xf32>
    %46 = vector.broadcast %45 : vector<1x1x1x4xf32> to vector<1x16x16x4xf32>
    %47 = arith.mulf %42, %46 : vector<1x16x16x4xf32>
    %48 = arith.addf %41, %47 : vector<1x16x16x4xf32>
    %c0_49 = arith.constant 0 : index
    %c1_50 = arith.constant 1 : index
    %c1_51 = arith.constant 1 : index
    %c0_52 = arith.constant 0 : index
    %49 = vector.load %arg8[%c0_49, %c1_50, %c1_51, %c0_52] : memref<1x18x18x4xf32, #tpu.memory_space<vmem>>, vector<1x16x16x4xf32>
    %50 = vector.extract_strided_slice %19 {offsets = [4, 0, 0], sizes = [1, 1, 4], strides = [1, 1, 1]} : vector<9x1x4xf32> to vector<1x1x4xf32>
    %51 = vector.shape_cast %50 : vector<1x1x4xf32> to vector<1x4xf32>
    %52 = vector.shape_cast %51 : vector<1x4xf32> to vector<1x1x1x4xf32>
    %53 = vector.broadcast %52 : vector<1x1x1x4xf32> to vector<1x16x16x4xf32>
    %54 = arith.mulf %49, %53 : vector<1x16x16x4xf32>
    %55 = arith.addf %48, %54 : vector<1x16x16x4xf32>
    %c0_53 = arith.constant 0 : index
    %c1_54 = arith.constant 1 : index
    %c2_55 = arith.constant 2 : index
    %c0_56 = arith.constant 0 : index
    %56 = vector.load %arg8[%c0_53, %c1_54, %c2_55, %c0_56] : memref<1x18x18x4xf32, #tpu.memory_space<vmem>>, vector<1x16x16x4xf32>
    %57 = vector.extract_strided_slice %19 {offsets = [5, 0, 0], sizes = [1, 1, 4], strides = [1, 1, 1]} : vector<9x1x4xf32> to vector<1x1x4xf32>
    %58 = vector.shape_cast %57 : vector<1x1x4xf32> to vector<1x4xf32>
    %59 = vector.shape_cast %58 : vector<1x4xf32> to vector<1x1x1x4xf32>
    %60 = vector.broadcast %59 : vector<1x1x1x4xf32> to vector<1x16x16x4xf32>
    %61 = arith.mulf %56, %60 : vector<1x16x16x4xf32>
    %62 = arith.addf %55, %61 : vector<1x16x16x4xf32>
    %c0_57 = arith.constant 0 : index
    %c2_58 = arith.constant 2 : index
    %c0_59 = arith.constant 0 : index
    %c0_60 = arith.constant 0 : index
    %63 = vector.load %arg8[%c0_57, %c2_58, %c0_59, %c0_60] : memref<1x18x18x4xf32, #tpu.memory_space<vmem>>, vector<1x16x16x4xf32>
    %64 = vector.extract_strided_slice %19 {offsets = [6, 0, 0], sizes = [1, 1, 4], strides = [1, 1, 1]} : vector<9x1x4xf32> to vector<1x1x4xf32>
    %65 = vector.shape_cast %64 : vector<1x1x4xf32> to vector<1x4xf32>
    %66 = vector.shape_cast %65 : vector<1x4xf32> to vector<1x1x1x4xf32>
    %67 = vector.broadcast %66 : vector<1x1x1x4xf32> to vector<1x16x16x4xf32>
    %68 = arith.mulf %63, %67 : vector<1x16x16x4xf32>
    %69 = arith.addf %62, %68 : vector<1x16x16x4xf32>
    %c0_61 = arith.constant 0 : index
    %c2_62 = arith.constant 2 : index
    %c1_63 = arith.constant 1 : index
    %c0_64 = arith.constant 0 : index
    %70 = vector.load %arg8[%c0_61, %c2_62, %c1_63, %c0_64] : memref<1x18x18x4xf32, #tpu.memory_space<vmem>>, vector<1x16x16x4xf32>
    %71 = vector.extract_strided_slice %19 {offsets = [7, 0, 0], sizes = [1, 1, 4], strides = [1, 1, 1]} : vector<9x1x4xf32> to vector<1x1x4xf32>
    %72 = vector.shape_cast %71 : vector<1x1x4xf32> to vector<1x4xf32>
    %73 = vector.shape_cast %72 : vector<1x4xf32> to vector<1x1x1x4xf32>
    %74 = vector.broadcast %73 : vector<1x1x1x4xf32> to vector<1x16x16x4xf32>
    %75 = arith.mulf %70, %74 : vector<1x16x16x4xf32>
    %76 = arith.addf %69, %75 : vector<1x16x16x4xf32>
    %c0_65 = arith.constant 0 : index
    %c2_66 = arith.constant 2 : index
    %c2_67 = arith.constant 2 : index
    %c0_68 = arith.constant 0 : index
    %77 = vector.load %arg8[%c0_65, %c2_66, %c2_67, %c0_68] : memref<1x18x18x4xf32, #tpu.memory_space<vmem>>, vector<1x16x16x4xf32>
    %78 = vector.extract_strided_slice %19 {offsets = [8, 0, 0], sizes = [1, 1, 4], strides = [1, 1, 1]} : vector<9x1x4xf32> to vector<1x1x4xf32>
    %79 = vector.shape_cast %78 : vector<1x1x4xf32> to vector<1x4xf32>
    %80 = vector.shape_cast %79 : vector<1x4xf32> to vector<1x1x1x4xf32>
    %81 = vector.broadcast %80 : vector<1x1x1x4xf32> to vector<1x16x16x4xf32>
    %82 = arith.mulf %77, %81 : vector<1x16x16x4xf32>
    %83 = arith.addf %76, %82 : vector<1x16x16x4xf32>
    %84 = vector.shape_cast %83 : vector<1x16x16x4xf32> to vector<256x4xf32>
    %c0_69 = arith.constant 0 : index
    %c0_70 = arith.constant 0 : index
    %85 = vector.load %arg5[%c0_69, %c0_70] : memref<4x4xf32, #tpu.memory_space<vmem>>, vector<4x4xf32>
    %cst_71 = arith.constant dense<0.000000e+00> : vector<256x4xf32>
    %86 = tpu.matmul %84, %85, %cst_71 {dimension_numbers = #tpu.dot_dimension_numbers<[1], [0], [0], [1], [0, 0, 1, 1], [], []>} : vector<256x4xf32>, vector<4x4xf32>, vector<256x4xf32> -> vector<256x4xf32>
    %c0_72 = arith.constant 0 : index
    %c0_73 = arith.constant 0 : index
    %87 = vector.load %arg6[%c0_72, %c0_73] : memref<1x4xf32, #tpu.memory_space<vmem>>, vector<1x4xf32>
    %88 = vector.broadcast %87 : vector<1x4xf32> to vector<256x4xf32>
    %89 = arith.addf %86, %88 : vector<256x4xf32>
    %cst_74 = arith.constant 0.000000e+00 : f32
    %90 = vector.broadcast %cst_74 : f32 to vector<256x4xf32>
    %91 = arith.maximumf %89, %90 : vector<256x4xf32>
    %92 = vector.shape_cast %91 : vector<256x4xf32> to vector<1x16x16x4xf32>
    %c0_75 = arith.constant 0 : index
    %c0_76 = arith.constant 0 : index
    %c0_77 = arith.constant 0 : index
    %c0_78 = arith.constant 0 : index
    %93 = vector.load %arg7[%c0_75, %c0_76, %c0_77, %c0_78] : memref<1x16x16x4xf32, #tpu.memory_space<vmem>>, vector<1x16x16x4xf32>
    tpu.vector_store %arg7[%c0_75, %c0_76, %c0_77, %c0_78], %92 {strides = array<i32>} : memref<1x16x16x4xf32, #tpu.memory_space<vmem>>, vector<1x16x16x4xf32>,
    return
  }
  func.func @transform_0(%arg0: i32) -> (i32, i32, i32, i32) {
    %c0_i32 = arith.constant 0 : i32
    %c0_i32_0 = arith.constant 0 : i32
    %c0_i32_1 = arith.constant 0 : i32
    %c0_i32_2 = arith.constant 0 : i32
    return %arg0, %c0_i32, %c0_i32_0, %c0_i32_1 : i32, i32, i32, i32
  }
  func.func @transform_1(%arg0: i32) -> (i32, i32) {
    %c0_i32 = arith.constant 0 : i32
    %c0_i32_0 = arith.constant 0 : i32
    %c0_i32_1 = arith.constant 0 : i32
    return %c0_i32, %c0_i32_0 : i32, i32
  }
  func.func @transform_2(%arg0: i32) -> (i32, i32) {
    %c0_i32 = arith.constant 0 : i32
    %c0_i32_0 = arith.constant 0 : i32
    %c0_i32_1 = arith.constant 0 : i32
    return %c0_i32, %c0_i32_0 : i32, i32
  }
  func.func @transform_3(%arg0: i32) -> (i32, i32, i32) {
    %c0_i32 = arith.constant 0 : i32
    %c0_i32_0 = arith.constant 0 : i32
    %c0_i32_1 = arith.constant 0 : i32
    %c0_i32_2 = arith.constant 0 : i32
    return %c0_i32, %c0_i32_0, %c0_i32_1 : i32, i32, i32
  }
  func.func @transform_4(%arg0: i32) -> (i32, i32) {
    %c0_i32 = arith.constant 0 : i32
    %c0_i32_0 = arith.constant 0 : i32
    %c0_i32_1 = arith.constant 0 : i32
    return %c0_i32, %c0_i32_0 : i32, i32
  }
  func.func @transform_5(%arg0: i32) -> (i32, i32) {
    %c0_i32 = arith.constant 0 : i32
    %c0_i32_0 = arith.constant 0 : i32
    %c0_i32_1 = arith.constant 0 : i32
    return %c0_i32, %c0_i32_0 : i32, i32
  }
  func.func @transform_6(%arg0: i32) -> (i32, i32, i32, i32) {
    %c0_i32 = arith.constant 0 : i32
    %c0_i32_0 = arith.constant 0 : i32
    %c0_i32_1 = arith.constant 0 : i32
    %c0_i32_2 = arith.constant 0 : i32
    return %arg0, %c0_i32, %c0_i32_0, %c0_i32_1 : i32, i32, i32, i32
  }
}

</mosaic_0001>

<bundles_post_ra>
// kernel: tpu_custom_call.1
= control target key start
LH: loop header
LB: loop body
LE: loop exit
PB: predicated region body
PF: predicated region fallthrough
CT: control target
= control target key end

     0   :  { %s2005_s21 = smov 0   ;;  %s2875_s0 = inlined_call_operand.vmem [shape: f32[2,16,16,4], index: 0, kind: input, shape index: {}]   ;;  %s2876_s1 = inlined_call_operand.vmem [shape: f32[4,4], index: 1, kind: input, shape index: {}]   ;;  %s2877_s2 = inlined_call_operand.vmem [shape: f32[1,4], index: 2, kind: input, shape index: {}]   ;;  %s2878_s3 = inlined_call_operand.vmem [shape: f32[9,1,4], index: 3, kind: input, shape index: {}]   ;;  %s2879_s4 = inlined_call_operand.vmem [shape: f32[4,4], index: 4, kind: input, shape index: {}]   ;;  %s2880_s5 = inlined_call_operand.vmem [shape: f32[1,4], index: 5, kind: input, shape index: {}]   ;;  %s2881_s6 = inlined_call_operand.vmem [shape: f32[2,16,16,4], index: 6, kind: output, shape index: {}]  }
   0x1 LB: > { %s1850_s22 = sadd.s32 4294967295, %s1967_s21   ;;  %p1854_p0 = scmp.ge.s32.totalorder %s1967_s21, 1  ;;  %s1967_s21 = sphi %s2005_s21, %s16_s21  }
   0x2   : > { %p212_p1 = scmp.lt.s32.totalorder %s1967_s21, 3 }
   0x4   : > { %p213_p2 = pnand %p1854_p0, %p212_p1 }
   0x5   : > { %p242_p3 = scmp.lt.s32.totalorder (!%p213_p2), %s1850_s22, 1 }
   0x6   : > { %216 = sbr.rel (%p213_p2) target bundleno = 546 (0x222), region = 44 }
   0xb   : > { %v284_v0 = vld [vmem:[%s2876_s1] sm:$0xf]  ;;  %vm386_vm0 = vcmask 1043456   ;;  %s2883_s22 = smov (!%p242_p3, %s1850_s22), 1  ;;  %vm289_vm1 = vcmask 31744   ;;  %v1969_v21 = vmov 0.0  }
   0xc   : > { %1859 = vmatpush.msk.msra.mxu0 %vm386_vm0, %v284_v0  ;;  %1929 = vmatpush.msk.msra.mxu2 %vm386_vm0, %v284_v0  ;;  %s1927_s25 = sshll.u32 %s2883_s22, 8  ;;  %568 = vst.msk [vmem:[#allocation2] sm:$0xff] %vm289_vm1, %v1969_v21  ;;  %vm576_vm2 = vcmask 24576   ;;  %v2143_v29 = vld [vmem:[%s2877_s2] ss:$0 sm:$0xff]  ;;  %vm570_vm3 = vcmask 25600  }
   0xd   : > { %s2026_s28 = scalar_lea.vmem %s2875_s0, %s1927_s25  ;;  %569 = vst.msk [vmem:[#allocation2 + $0x8] sm:$0xff] %vm289_vm1, %v1969_v21  ;;  %v1514_v34 = vld [vmem:[%s2879_s4] sm:$0xf]  ;;  %s2664_s9 = scalar_lea.vmem %s2881_s6, %s1927_s25 }
   0xe   : > { %v252_v1 = vld [vmem:[%s2026_s28] sm:$0xff]  ;;  %v253_v2 = vld [vmem:[%s2026_s28 + $0x8] sm:$0xff]  ;;  %v254_v3 = vld [vmem:[%s2026_s28 + $0x10] sm:$0xff]  ;;  %577 = vst.msk [vmem:[#allocation2] sm:$0x1] %vm576_vm2, %v1969_v21  ;;  %1892 = vmatpush.msk.msra.mxu1 %vm386_vm0, %v1514_v34  ;;  %1930 = vmatpush.msk.msra.mxu3 %vm386_vm0, %v1514_v34 }
   0xf   : > { %1860 = vmatmul.msk.f32.vlgmr.msra.gmra.mxu0 %vm289_vm1, %v252_v1  ;;  %v255_v4 = vld [vmem:[%s2026_s28 + $0x18] sm:$0xff]  ;;  %v256_v5 = vld [vmem:[%s2026_s28 + $0x20] sm:$0xff]  ;;  %v257_v6 = vld [vmem:[%s2026_s28 + $0x28] sm:$0xff]  ;;  %578 = vst.msk [vmem:[#allocation2 + $0x18] sm:$0x1] %vm576_vm2, %v1969_v21 }
  0x10   : > { %v268_v7 = vld [vmem:[%s2026_s28 + $0x80] sm:$0xff]  ;;  %v258_v8 = vld [vmem:[%s2026_s28 + $0x30] sm:$0xff]  ;;  %v269_v9 = vld [vmem:[%s2026_s28 + $0x88] sm:$0xff]  ;;  %579 = vst.msk [vmem:[#allocation2 + $0x30] sm:$0x1] %vm576_vm2, %v1969_v21 }
  0x11   : > { %1876 = vmatmul.msk.f32.vlgmr.msra.gmra.mxu2 %vm289_vm1, %v268_v7  ;;  %v259_v10 = vld [vmem:[%s2026_s28 + $0x38] sm:$0xff]  ;;  %v270_v11 = vld [vmem:[%s2026_s28 + $0x90] sm:$0xff]  ;;  %v260_v12 = vld [vmem:[%s2026_s28 + $0x40] sm:$0xff]  ;;  %573 = vst.msk [vmem:[#allocation2 + $0x198] sm:$0xff] %vm289_vm1, %v1969_v21 }
  0x12   : > { %v271_v13 = vld [vmem:[%s2026_s28 + $0x98] sm:$0xff]  ;;  %v261_v14 = vld [vmem:[%s2026_s28 + $0x48] sm:$0xff]  ;;  %v272_v15 = vld [vmem:[%s2026_s28 + $0xa0] sm:$0xff]  ;;  %574 = vst.msk [vmem:[#allocation2 + $0x1a0] sm:$0xff] %vm289_vm1, %v1969_v21 }
  0x13   : > { %v262_v16 = vld [vmem:[%s2026_s28 + $0x50] sm:$0xff]  ;;  %v273_v17 = vld [vmem:[%s2026_s28 + $0xa8] sm:$0xff]  ;;  %v263_v18 = vld [vmem:[%s2026_s28 + $0x58] sm:$0xff]  ;;  %580 = vst.msk [vmem:[#allocation2 + $0x48] sm:$0x1] %vm576_vm2, %v1969_v21 }
  0x14   : > { %v274_v19 = vld [vmem:[%s2026_s28 + $0xb0] sm:$0xff]  ;;  %v264_v20 = vld [vmem:[%s2026_s28 + $0x60] sm:$0xff]  ;;  %v275_v22 = vld [vmem:[%s2026_s28 + $0xb8] sm:$0xff]  ;;  %581 = vst.msk [vmem:[#allocation2 + $0x60] sm:$0x1] %vm576_vm2, %v1969_v21 }
  0x15   : > { %v265_v23 = vld [vmem:[%s2026_s28 + $0x68] sm:$0xff]  ;;  %582 = vst.msk [vmem:[#allocation2 + $0x78] sm:$0x1] %vm576_vm2, %v1969_v21  ;;  %v276_v24 = vld [vmem:[%s2026_s28 + $0xc0] sm:$0xff]  ;;  %v266_v25 = vld [vmem:[%s2026_s28 + $0x70] sm:$0xff] }
  0x16   : > { %583 = vst.msk [vmem:[#allocation2 + $0x90] sm:$0x1] %vm576_vm2, %v1969_v21  ;;  %v277_v26 = vld [vmem:[%s2026_s28 + $0xc8] sm:$0xff]  ;;  %v267_v27 = vld [vmem:[%s2026_s28 + $0x78] sm:$0xff]  ;;  %v278_v28 = vld [vmem:[%s2026_s28 + $0xd0] sm:$0xff] }
  0x17   : > { %1861 = vmatmul.msk.f32.gmra.mxu0 %vm289_vm1, %v253_v2  ;;  %584 = vst.msk [vmem:[#allocation2 + $0xa8] sm:$0x1] %vm576_vm2, %v1969_v21  ;;  %v279_v32 = vld [vmem:[%s2026_s28 + $0xd8] sm:$0xff]  ;;  %v2179_v37 = vld [vmem:[%s2878_s3] ss:$0 sm:$0xff]  ;;  %v721_v40 = vld [vmem:[#allocation2 + $0x1] sm:$0xff] }
  0x18   : > { %585 = vst.msk [vmem:[#allocation2 + $0xc0] sm:$0x1] %vm576_vm2, %v1969_v21  ;;  %v2184_v38 = vld [vmem:[%s2878_s3 + $0x1] ss:$0 sm:$0xff]  ;;  %v2197_v45 = vld [vmem:[%s2878_s3 + $0x2] ss:$0 sm:$0xff] }
  0x19   : > { %1877 = vmatmul.msk.f32.gmra.mxu2 %vm289_vm1, %v269_v9  ;;  %586 = vst.msk [vmem:[#allocation2 + $0xd8] sm:$0x1] %vm576_vm2, %v1969_v21  ;;  %v622_v39 = vld [vmem:[#allocation2] sm:$0xff]  ;;  %v756_v44 = vmul.f32 %v2184_v38, %v721_v40  ;;  %v623_v46 = vld [vmem:[#allocation2 + $0x8] sm:$0xff] }
  0x1a   : > { %587 = vst.msk [vmem:[#allocation2 + $0xf0] sm:$0x1] %vm576_vm2, %v1969_v21  ;;  %v280_v41 = vld [vmem:[%s2026_s28 + $0xe0] sm:$0xff]  ;;  %v657_v43 = vmul.f32 %v2179_v37, %v622_v39  ;;  %v658_v50 = vmul.f32 %v2179_v37, %v623_v46  ;;  %v281_v59 = vld [vmem:[%s2026_s28 + $0xe8] sm:$0xff] }
  0x1b   : > { %588 = vst.msk [vmem:[#allocation2 + $0x108] sm:$0x1] %vm576_vm2, %v1969_v21  ;;  %v820_v47 = vld [vmem:[#allocation2 + $0x2] sm:$0xff] }
  0x1c   : > { %589 = vst.msk [vmem:[#allocation2 + $0x120] sm:$0x1] %vm576_vm2, %v1969_v21  ;;  %v788_v53 = vadd.f32 %v756_v44, %v657_v43  ;;  %v855_v54 = vmul.f32 %v2197_v45, %v820_v47  ;;  %v2206_v55 = vld [vmem:[%s2878_s3 + $0x3] ss:$0 sm:$0xff]  ;;  %v2216_v1 = vld [vmem:[%s2878_s3 + $0x4] ss:$0 sm:$0xff] }
  0x1d   : > { %590 = vst.msk [vmem:[#allocation2 + $0x138] sm:$0x1] %vm576_vm2, %v1969_v21  ;;  %v2221_v2 = vld [vmem:[%s2878_s3 + $0x5] ss:$0 sm:$0xff] }
  0x1e   : > { %591 = vst.msk [vmem:[#allocation2 + $0x150] sm:$0x1] %vm576_vm2, %v1969_v21  ;;  %v887_v62 = vadd.f32 %v855_v54, %v788_v53 }
  0x1f   : > { %1862 = vmatmul.msk.f32.gmra.mxu0 %vm289_vm1, %v254_v3  ;;  %592 = vst.msk [vmem:[#allocation2 + $0x168] sm:$0x1] %vm576_vm2, %v1969_v21 }
  0x20   : > { %593 = vst.msk [vmem:[#allocation2 + $0x180] sm:$0x1] %vm576_vm2, %v1969_v21 }
  0x21   : > { %1878 = vmatmul.msk.f32.gmra.mxu2 %vm289_vm1, %v270_v11  ;;  %596 = vst.msk [vmem:[#allocation2 + $0x29] sm:$0x1] %vm576_vm2, %v1969_v21 }
  0x22   : > { %597 = vst.msk [vmem:[#allocation2 + $0x41] sm:$0x1] %vm576_vm2, %v1969_v21 }
  0x23   : > { %598 = vst.msk [vmem:[#allocation2 + $0x59] sm:$0x1] %vm576_vm2, %v1969_v21 }
  0x24   : > { %599 = vst.msk [vmem:[#allocation2 + $0x71] sm:$0x1] %vm576_vm2, %v1969_v21 }
  0x25   : > { %600 = vst.msk [vmem:[#allocation2 + $0x89] sm:$0x1] %vm576_vm2, %v1969_v21 }
  0x26   : > { %601 = vst.msk [vmem:[#allocation2 + $0xa1] sm:$0x1] %vm576_vm2, %v1969_v21 }
  0x27   : > { %1863 = vmatmul.msk.f32.gmra.mxu0 %vm289_vm1, %v255_v4  ;;  %602 = vst.msk [vmem:[#allocation2 + $0xb9] sm:$0x1] %vm576_vm2, %v1969_v21 }
  0x28   : > { %603 = vst.msk [vmem:[#allocation2 + $0xd1] sm:$0x1] %vm576_vm2, %v1969_v21 }
  0x29   : > { %1879 = vmatmul.msk.f32.gmra.mxu2 %vm289_vm1, %v271_v13  ;;  %604 = vst.msk [vmem:[#allocation2 + $0xe9] sm:$0x1] %vm576_vm2, %v1969_v21 }
  0x2a   : > { %605 = vst.msk [vmem:[#allocation2 + $0x101] sm:$0x1] %vm576_vm2, %v1969_v21 }
  0x2b   : > { %606 = vst.msk [vmem:[#allocation2 + $0x119] sm:$0x1] %vm576_vm2, %v1969_v21 }
  0x2c   : > { %607 = vst.msk [vmem:[#allocation2 + $0x131] sm:$0x1] %vm576_vm2, %v1969_v21 }
  0x2d   : > { %608 = vst.msk [vmem:[#allocation2 + $0x149] sm:$0x1] %vm576_vm2, %v1969_v21 }
  0x2e   : > { %609 = vst.msk [vmem:[#allocation2 + $0x161] sm:$0x1] %vm576_vm2, %v1969_v21 }
  0x2f   : > { %1864 = vmatmul.msk.f32.gmra.mxu0 %vm289_vm1, %v256_v5  ;;  %610 = vst.msk [vmem:[#allocation2 + $0x179] sm:$0x1] %vm576_vm2, %v1969_v21 }
  0x30   : > { %611 = vst.msk [vmem:[#allocation2 + $0x191] sm:$0x1] %vm576_vm2, %v1969_v21 }
  0x31   : > { %1880 = vmatmul.msk.f32.gmra.mxu2 %vm289_vm1, %v272_v15  ;;  %594 = vst.msk [vmem:[#allocation2 + $0x198] sm:$0x1] %vm576_vm2, %v1969_v21  ;;  %v282_v15 = vld [vmem:[%s2026_s28 + $0xf0] sm:$0xff] }
  0x32   : > { %571 = vst.msk [vmem:[#allocation2 + $0x10] sm:$0x3] %vm570_vm3, %v1969_v21 }
  0x33   : > { %595 = vst.msk [vmem:[#allocation2 + $0x11] sm:$0x1] %vm576_vm2, %v1969_v21 }
  0x34   : > { %575 = vst.msk [vmem:[#allocation2 + $0x1a8] sm:$0x3] %vm570_vm3, %v1969_v21 }
  0x35   : > { %612 = vst.msk [vmem:[#allocation2 + $0x1a9] sm:$0x1] %vm576_vm2, %v1969_v21 }
  0x37   : > { %1865 = vmatmul.msk.f32.gmra.mxu0 %vm289_vm1, %v257_v6 }
  0x39   : > { %1881 = vmatmul.msk.f32.gmra.mxu2 %vm289_vm1, %v273_v17  ;;  %v722_v48 = vld [vmem:[#allocation2 + $0x9] sm:$0xff] }
  0x3a   : > { %v757_v51 = vmul.f32 %v2184_v38, %v722_v48  ;;  %v821_v56 = vld [vmem:[#allocation2 + $0xa] sm:$0xff] }
  0x3b   : > { %v856_v61 = vmul.f32 %v2197_v45, %v821_v56 }
  0x3c   : > { %v789_v60 = vadd.f32 %v757_v51, %v658_v50 }
  0x3e   : > { %v888_v6 = vadd.f32 %v856_v61, %v789_v60 }
  0x3f   : > { %1866 = vmatmul.msk.f32.gmra.mxu0 %vm289_vm1, %v258_v8 }
  0x41   : > { %1882 = vmatmul.msk.f32.gmra.mxu2 %vm289_vm1, %v274_v19 }
  0x47   : > { %1867 = vmatmul.msk.f32.gmra.mxu0 %vm289_vm1, %v259_v10  ;;  %v2228_v10 = vld [vmem:[%s2878_s3 + $0x6] ss:$0 sm:$0xff] }
  0x49   : > { %1883 = vmatmul.msk.f32.gmra.mxu2 %vm289_vm1, %v275_v22  ;;  %v2243_v22 = vld [vmem:[%s2878_s3 + $0x7] ss:$0 sm:$0xff] }
  0x4f   : > { %1868 = vmatmul.msk.f32.gmra.mxu0 %vm289_vm1, %v260_v12 }
  0x51   : > { %1884 = vmatmul.msk.f32.gmra.mxu2 %vm289_vm1, %v276_v24 }
  0x57   : > { %1869 = vmatmul.msk.f32.gmra.mxu0 %vm289_vm1, %v261_v14 }
  0x59   : > { %1885 = vmatmul.msk.f32.gmra.mxu2 %vm289_vm1, %v277_v26 }
  0x5f   : > { %1870 = vmatmul.msk.f32.gmra.mxu0 %vm289_vm1, %v262_v16 }
  0x61   : > { %1886 = vmatmul.msk.f32.gmra.mxu2 %vm289_vm1, %v278_v28 }
  0x67   : > { %1871 = vmatmul.msk.f32.gmra.mxu0 %vm289_vm1, %v263_v18 }
  0x69   : > { %1887 = vmatmul.msk.f32.gmra.mxu2 %vm289_vm1, %v279_v32  ;;  %v2251_v32 = vld [vmem:[%s2878_s3 + $0x8] ss:$0 sm:$0xff] }
  0x6f   : > { %1872 = vmatmul.msk.f32.gmra.mxu0 %vm289_vm1, %v264_v20 }
  0x71   : > { %1888 = vmatmul.msk.f32.gmra.mxu2 %vm289_vm1, %v280_v41  ;;  %v283_v41 = vld [vmem:[%s2026_s28 + $0xf8] sm:$0xff] }
  0x77   : > { %1873 = vmatmul.msk.f32.gmra.mxu0 %vm289_vm1, %v265_v23 }
  0x79   : > { %1889 = vmatmul.msk.f32.gmra.mxu2 %vm289_vm1, %v281_v59 }
  0x7f   : > { %1874 = vmatmul.msk.f32.gmra.mxu0 %vm289_vm1, %v266_v25 }
  0x81   : > { %1890 = vmatmul.msk.f32.gmra.mxu2 %vm289_vm1, %v282_v15 }
  0x87   : > { %1875 = vmatmul.msk.f32.gmra.mxu0 %vm289_vm1, %v267_v27 }
  0x89   : > { %1891 = vmatmul.msk.f32.gmra.mxu2 %vm289_vm1, %v283_v41 }
  0x8c   : > { %v407_v30 = vpop.f32.mrf.mxu0 }
  0x8d   : > { %v408_v31 = vadd.f32 %v2143_v29, %v407_v30 }
  0x8f   : > { %v503_v33 = vmax.f32 %v408_v31, 0.0 }
  0x91   : > { %536 = vst.msk [vmem:[#allocation2 + $0x19] sm:$0xff] %vm289_vm1, %v503_v33 }
  0x94   : > { %v410_v35 = vpop.f32.mrf.mxu0 }
  0x95   : > { %v411_v36 = vadd.f32 %v2143_v29, %v410_v35 }
  0x97   : > { %v504_v42 = vmax.f32 %v411_v36, 0.0 }
  0x98   : > { %v919_v57 = vld [vmem:[#allocation2 + $0x18] sm:$0xff] }
  0x99   : > { %537 = vst.msk [vmem:[#allocation2 + $0x21] sm:$0xff] %vm289_vm1, %v504_v42  ;;  %v954_v63 = vmul.f32 %v2206_v55, %v919_v57  ;;  %v1018_v4 = vld [vmem:[#allocation2 + $0x19] sm:$0xff]  ;;  %v659_v27 = vmul.f32 %v2179_v37, %v919_v57 }
  0x9a   : > { %v1053_v12 = vmul.f32 %v2216_v1, %v1018_v4  ;;  %v758_v28 = vmul.f32 %v2184_v38, %v1018_v4 }
  0x9b   : > { %v986_v9 = vadd.f32 %v954_v63, %v887_v62 }
  0x9c   : > { %v413_v49 = vpop.f32.mrf.mxu0  ;;  %v790_v46 = vadd.f32 %v758_v28, %v659_v27 }
  0x9d   : > { %v414_v52 = vadd.f32 %v2143_v29, %v413_v49  ;;  %v1085_v18 = vadd.f32 %v1053_v12, %v986_v9 }
  0x9f   : > { %v505_v58 = vmax.f32 %v414_v52, 0.0 }
  0xa0   : > { %v920_v0 = vld [vmem:[#allocation2 + $0x20] sm:$0xff] }
  0xa1   : > { %538 = vst.msk [vmem:[#allocation2 + $0x31] sm:$0xff] %vm289_vm1, %v505_v58  ;;  %v1117_v5 = vld [vmem:[#allocation2 + $0x1a] sm:$0xff]  ;;  %v955_v7 = vmul.f32 %v2206_v55, %v920_v0  ;;  %v1118_v23 = vld [vmem:[#allocation2 + $0x22] sm:$0xff]  ;;  %v660_v34 = vmul.f32 %v2179_v37, %v920_v0 }
  0xa2   : > { %v1152_v13 = vmul.f32 %v2221_v2, %v1117_v5  ;;  %v1019_v14 = vld [vmem:[#allocation2 + $0x21] sm:$0xff]  ;;  %v1153_v33 = vmul.f32 %v2221_v2, %v1118_v23  ;;  %v857_v40 = vmul.f32 %v2197_v45, %v1117_v5  ;;  %v858_v58 = vmul.f32 %v2197_v45, %v1118_v23 }
  0xa3   : > { %v987_v17 = vadd.f32 %v955_v7, %v888_v6  ;;  %v1054_v20 = vmul.f32 %v2216_v1, %v1019_v14  ;;  %v759_v35 = vmul.f32 %v2184_v38, %v1019_v14 }
  0xa4   : > { %v416_v3 = vpop.f32.mrf.mxu0  ;;  %v1184_v21 = vadd.f32 %v1152_v13, %v1085_v18  ;;  %v889_v56 = vadd.f32 %v857_v40, %v790_v46  ;;  %v455_v13 = vpop.f32.mrf.mxu2 }
  0xa5   : > { %v417_v8 = vadd.f32 %v2143_v29, %v416_v3  ;;  %v1086_v26 = vadd.f32 %v1054_v20, %v987_v17  ;;  %v791_v52 = vadd.f32 %v759_v35, %v660_v34  ;;  %v456_v18 = vadd.f32 %v2143_v29, %v455_v13 }
  0xa7   : > { %v506_v11 = vmax.f32 %v417_v8, 0.0  ;;  %v1185_v43 = vadd.f32 %v1153_v33, %v1086_v26  ;;  %v890_v0 = vadd.f32 %v858_v58, %v791_v52  ;;  %v519_v28 = vmax.f32 %v456_v18, 0.0 }
  0xa8   : > { %v2233_v16 = vld [vmem:[#allocation2 + $0x30] sm:$0xff] }
  0xa9   : > { %539 = vst.msk [vmem:[#allocation2 + $0x39] sm:$0xff] %vm289_vm1, %v506_v11  ;;  %v1252_v19 = vmul.f32 %v2228_v10, %v2233_v16  ;;  %v1316_v25 = vld [vmem:[#allocation2 + $0x31] sm:$0xff]  ;;  %v956_v50 = vmul.f32 %v2206_v55, %v2233_v16 }
  0xaa   : > { %v1351_v39 = vmul.f32 %v2243_v22, %v1316_v25  ;;  %v1055_v5 = vmul.f32 %v2216_v1, %v1316_v25  ;;  %v760_v23 = vmul.f32 %v2184_v38, %v1316_v25  ;;  %552 = vst.msk [vmem:[#allocation2 + $0xd9] sm:$0xff] %vm289_vm1, %v519_v28 }
  0xab   : > { %v1284_v31 = vadd.f32 %v1252_v19, %v1184_v21  ;;  %v988_v61 = vadd.f32 %v956_v50, %v889_v56  ;;  %v661_v21 = vmul.f32 %v2179_v37, %v2233_v16 }
  0xac   : > { %v419_v24 = vpop.f32.mrf.mxu0 }
  0xad   : > { %v420_v30 = vadd.f32 %v2143_v29, %v419_v24  ;;  %v1383_v47 = vadd.f32 %v1351_v39, %v1284_v31  ;;  %v1087_v9 = vadd.f32 %v1055_v5, %v988_v61  ;;  %v792_v39 = vadd.f32 %v760_v23, %v661_v21 }
  0xaf   : > { %v507_v36 = vmax.f32 %v420_v30, 0.0 }
  0xb0   : > { %v1415_v42 = vld [vmem:[#allocation2 + $0x32] sm:$0xff]  ;;  %v1416_v63 = vld [vmem:[#allocation2 + $0x3a] sm:$0xff] }
  0xb1   : > { %v1218_v44 = vld [vmem:[#allocation2 + $0x38] sm:$0xff]  ;;  %540 = vst.msk [vmem:[#allocation2 + $0x49] sm:$0xff] %vm289_vm1, %v507_v36  ;;  %v1450_v48 = vmul.f32 %v2251_v32, %v1415_v42  ;;  %v1154_v6 = vmul.f32 %v2221_v2, %v1415_v42  ;;  %v1451_v8 = vmul.f32 %v2251_v32, %v1416_v63  ;;  %v859_v30 = vmul.f32 %v2197_v45, %v1415_v42 }
  0xb2   : > { %v1253_v49 = vmul.f32 %v2228_v10, %v1218_v44  ;;  %v1317_v51 = vld [vmem:[#allocation2 + $0x39] sm:$0xff]  ;;  %v957_v62 = vmul.f32 %v2206_v55, %v1218_v44  ;;  %v662_v31 = vmul.f32 %v2179_v37, %v1218_v44  ;;  %v1155_v16 = vmul.f32 %v2221_v2, %v1416_v63 }
  0xb3   : > { %v1482_v53 = vadd.f32 %v1450_v48, %v1383_v47  ;;  %v1352_v60 = vmul.f32 %v2243_v22, %v1317_v51  ;;  %v1186_v15 = vadd.f32 %v1154_v6, %v1087_v9  ;;  %v1056_v17 = vmul.f32 %v2216_v1, %v1317_v51 }
  0xb4   : > { %v1285_v54 = vadd.f32 %v1253_v49, %v1185_v43  ;;  %v422_v57 = vpop.f32.mrf.mxu0  ;;  %v989_v12 = vadd.f32 %v957_v62, %v890_v0  ;;  %v761_v33 = vmul.f32 %v2184_v38, %v1317_v51  ;;  %v891_v47 = vadd.f32 %v859_v30, %v792_v39  ;;  %v458_v49 = vpop.f32.mrf.mxu2 }
  0xb5   : > { %v423_v59 = vadd.f32 %v2143_v29, %v422_v57  ;;  %1893 = vmatmul.msk.f32.vlgmr.msra.gmra.mxu1 %vm289_vm1, %v1482_v53  ;;  %v459_v52 = vadd.f32 %v2143_v29, %v458_v49  ;;  %v860_v56 = vmul.f32 %v2197_v45, %v1416_v63 }
  0xb6   : > { %v1384_v4 = vadd.f32 %v1352_v60, %v1285_v54  ;;  %v1088_v27 = vadd.f32 %v1056_v17, %v989_v12  ;;  %v793_v48 = vadd.f32 %v761_v33, %v662_v31 }
  0xb7   : > { %v508_v3 = vmax.f32 %v423_v59, 0.0  ;;  %v520_v60 = vmax.f32 %v459_v52, 0.0 }
  0xb8   : > { %v2272_v7 = vld [vmem:[#allocation2 + $0x48] sm:$0xff]  ;;  %v1483_v14 = vadd.f32 %v1451_v8, %v1384_v4  ;;  %v1187_v43 = vadd.f32 %v1155_v16, %v1088_v27  ;;  %v892_v62 = vadd.f32 %v860_v56, %v793_v48 }
  0xb9   : > { %541 = vst.msk [vmem:[#allocation2 + $0x51] sm:$0xff] %vm289_vm1, %v508_v3  ;;  %v1254_v11 = vmul.f32 %v2228_v10, %v2272_v7  ;;  %v1318_v20 = vld [vmem:[#allocation2 + $0x49] sm:$0xff]  ;;  %v958_v40 = vmul.f32 %v2206_v55, %v2272_v7  ;;  %v663_v21 = vmul.f32 %v2179_v37, %v2272_v7 }
  0xba   : > { %v1353_v35 = vmul.f32 %v2243_v22, %v1318_v20  ;;  %v1057_v4 = vmul.f32 %v2216_v1, %v1318_v20  ;;  %553 = vst.msk [vmem:[#allocation2 + $0xe1] sm:$0xff] %vm289_vm1, %v520_v60  ;;  %v762_v23 = vmul.f32 %v2184_v38, %v1318_v20 }
  0xbb   : > { %v1286_v26 = vadd.f32 %v1254_v11, %v1186_v15  ;;  %v990_v54 = vadd.f32 %v958_v40, %v891_v47 }
  0xbc   : > { %v425_v19 = vpop.f32.mrf.mxu0  ;;  %v461_v12 = vpop.f32.mrf.mxu2  ;;  %v794_v39 = vadd.f32 %v762_v23, %v663_v21 }
  0xbd   : > { %v426_v24 = vadd.f32 %v2143_v29, %v425_v19  ;;  %1894 = vmatmul.msk.f32.gmra.mxu1 %vm289_vm1, %v1483_v14  ;;  %v1385_v41 = vadd.f32 %v1353_v35, %v1286_v26  ;;  %v1089_v8 = vadd.f32 %v1057_v4, %v990_v54  ;;  %v462_v17 = vadd.f32 %v2143_v29, %v461_v12 }
  0xbf   : > { %v509_v34 = vmax.f32 %v426_v24, 0.0  ;;  %v521_v28 = vmax.f32 %v462_v17, 0.0 }
  0xc0   : > { %v1417_v25 = vld [vmem:[#allocation2 + $0x4a] sm:$0xff]  ;;  %v1418_v61 = vld [vmem:[#allocation2 + $0x52] sm:$0xff] }
  0xc1   : > { %v1220_v36 = vld [vmem:[#allocation2 + $0x50] sm:$0xff]  ;;  %542 = vst.msk [vmem:[#allocation2 + $0x61] sm:$0xff] %vm289_vm1, %v509_v34  ;;  %v1452_v42 = vmul.f32 %v2251_v32, %v1417_v25  ;;  %v1156_v5 = vmul.f32 %v2221_v2, %v1417_v25  ;;  %v1453_v6 = vmul.f32 %v2251_v32, %v1418_v61  ;;  %v861_v30 = vmul.f32 %v2197_v45, %v1417_v25 }
  0xc2   : > { %v1255_v44 = vmul.f32 %v2228_v10, %v1220_v36  ;;  %v1319_v46 = vld [vmem:[#allocation2 + $0x51] sm:$0xff]  ;;  %v959_v59 = vmul.f32 %v2206_v55, %v1220_v36  ;;  %v664_v31 = vmul.f32 %v2179_v37, %v1220_v36  ;;  %v1157_v7 = vmul.f32 %v2221_v2, %v1418_v61  ;;  %554 = vst.msk [vmem:[#allocation2 + $0xf1] sm:$0xff] %vm289_vm1, %v521_v28 }
  0xc3   : > { %v1484_v50 = vadd.f32 %v1452_v42, %v1385_v41  ;;  %v1354_v58 = vmul.f32 %v2243_v22, %v1319_v46  ;;  %v1188_v14 = vadd.f32 %v1156_v5, %v1089_v8  ;;  %v1058_v15 = vmul.f32 %v2216_v1, %v1319_v46 }
  0xc4   : > { %v1287_v51 = vadd.f32 %v1255_v44, %v1187_v43  ;;  %v428_v53 = vpop.f32.mrf.mxu0  ;;  %v991_v11 = vadd.f32 %v959_v59, %v892_v62  ;;  %v763_v33 = vmul.f32 %v2184_v38, %v1319_v46  ;;  %v893_v44 = vadd.f32 %v861_v30, %v794_v39  ;;  %v464_v47 = vpop.f32.mrf.mxu2 }
  0xc5   : > { %v429_v57 = vadd.f32 %v2143_v29, %v428_v53  ;;  %1895 = vmatmul.msk.f32.gmra.mxu1 %vm289_vm1, %v1484_v50  ;;  %v465_v50 = vadd.f32 %v2143_v29, %v464_v47  ;;  %v862_v53 = vmul.f32 %v2197_v45, %v1418_v61 }
  0xc6   : > { %v1386_v3 = vadd.f32 %v1354_v58, %v1287_v51  ;;  %v1090_v27 = vadd.f32 %v1058_v15, %v991_v11  ;;  %v795_v46 = vadd.f32 %v763_v33, %v664_v31 }
  0xc7   : > { %v510_v0 = vmax.f32 %v429_v57, 0.0  ;;  %v522_v58 = vmax.f32 %v465_v50, 0.0 }
  0xc8   : > { %v2305_v63 = vld [vmem:[#allocation2 + $0x60] sm:$0xff]  ;;  %v1485_v13 = vadd.f32 %v1453_v6, %v1386_v3  ;;  %v1189_v41 = vadd.f32 %v1157_v7, %v1090_v27  ;;  %v894_v60 = vadd.f32 %v862_v53, %v795_v46 }
  0xc9   : > { %543 = vst.msk [vmem:[#allocation2 + $0x69] sm:$0xff] %vm289_vm1, %v510_v0  ;;  %v1256_v9 = vmul.f32 %v2228_v10, %v2305_v63  ;;  %v1320_v19 = vld [vmem:[#allocation2 + $0x61] sm:$0xff]  ;;  %v960_v40 = vmul.f32 %v2206_v55, %v2305_v63  ;;  %v665_v21 = vmul.f32 %v2179_v37, %v2305_v63 }
  0xca   : > { %v1355_v35 = vmul.f32 %v2243_v22, %v1320_v19  ;;  %v1059_v3 = vmul.f32 %v2216_v1, %v1320_v19  ;;  %555 = vst.msk [vmem:[#allocation2 + $0xf9] sm:$0xff] %vm289_vm1, %v522_v58  ;;  %v764_v23 = vmul.f32 %v2184_v38, %v1320_v19 }
  0xcb   : > { %v1288_v26 = vadd.f32 %v1256_v9, %v1188_v14  ;;  %v992_v52 = vadd.f32 %v960_v40, %v893_v44 }
  0xcc   : > { %v431_v18 = vpop.f32.mrf.mxu0  ;;  %v467_v11 = vpop.f32.mrf.mxu2  ;;  %v796_v39 = vadd.f32 %v764_v23, %v665_v21 }
  0xcd   : > { %v432_v24 = vadd.f32 %v2143_v29, %v431_v18  ;;  %1896 = vmatmul.msk.f32.gmra.mxu1 %vm289_vm1, %v1485_v13  ;;  %v1387_v25 = vadd.f32 %v1355_v35, %v1288_v26  ;;  %v1091_v6 = vadd.f32 %v1059_v3, %v992_v52  ;;  %v468_v15 = vadd.f32 %v2143_v29, %v467_v11 }
  0xcf   : > { %v511_v34 = vmax.f32 %v432_v24, 0.0  ;;  %v523_v28 = vmax.f32 %v468_v15, 0.0 }
  0xd0   : > { %v1419_v20 = vld [vmem:[#allocation2 + $0x62] sm:$0xff]  ;;  %v1420_v59 = vld [vmem:[#allocation2 + $0x6a] sm:$0xff] }
  0xd1   : > { %v1222_v16 = vld [vmem:[#allocation2 + $0x68] sm:$0xff]  ;;  %544 = vst.msk [vmem:[#allocation2 + $0x79] sm:$0xff] %vm289_vm1, %v511_v34  ;;  %v1454_v36 = vmul.f32 %v2251_v32, %v1419_v20  ;;  %v1158_v4 = vmul.f32 %v2221_v2, %v1419_v20  ;;  %v1455_v5 = vmul.f32 %v2251_v32, %v1420_v59  ;;  %v863_v30 = vmul.f32 %v2197_v45, %v1419_v20 }
  0xd2   : > { %v1257_v42 = vmul.f32 %v2228_v10, %v1222_v16  ;;  %v1321_v43 = vld [vmem:[#allocation2 + $0x69] sm:$0xff]  ;;  %v961_v57 = vmul.f32 %v2206_v55, %v1222_v16  ;;  %v666_v31 = vmul.f32 %v2179_v37, %v1222_v16  ;;  %v1159_v63 = vmul.f32 %v2221_v2, %v1420_v59  ;;  %556 = vst.msk [vmem:[#allocation2 + $0x109] sm:$0xff] %vm289_vm1, %v523_v28 }
  0xd3   : > { %v1486_v48 = vadd.f32 %v1454_v36, %v1387_v25  ;;  %v1356_v56 = vmul.f32 %v2243_v22, %v1321_v43  ;;  %v1190_v13 = vadd.f32 %v1158_v4, %v1091_v6  ;;  %v1060_v14 = vmul.f32 %v2216_v1, %v1321_v43 }
  0xd4   : > { %v1289_v49 = vadd.f32 %v1257_v42, %v1189_v41  ;;  %v434_v51 = vpop.f32.mrf.mxu0  ;;  %v993_v9 = vadd.f32 %v961_v57, %v894_v60  ;;  %v765_v33 = vmul.f32 %v2184_v38, %v1321_v43  ;;  %v895_v42 = vadd.f32 %v863_v30, %v796_v39  ;;  %v470_v44 = vpop.f32.mrf.mxu2 }
  0xd5   : > { %v435_v54 = vadd.f32 %v2143_v29, %v434_v51  ;;  %1897 = vmatmul.msk.f32.gmra.mxu1 %vm289_vm1, %v1486_v48  ;;  %v471_v48 = vadd.f32 %v2143_v29, %v470_v44  ;;  %v864_v51 = vmul.f32 %v2197_v45, %v1420_v59 }
  0xd6   : > { %v1388_v0 = vadd.f32 %v1356_v56, %v1289_v49  ;;  %v1092_v27 = vadd.f32 %v1060_v14, %v993_v9  ;;  %v797_v43 = vadd.f32 %v765_v33, %v666_v31 }
  0xd7   : > { %v512_v62 = vmax.f32 %v435_v54, 0.0  ;;  %v524_v56 = vmax.f32 %v471_v48, 0.0 }
  0xd8   : > { %v2338_v61 = vld [vmem:[#allocation2 + $0x78] sm:$0xff]  ;;  %v1487_v12 = vadd.f32 %v1455_v5, %v1388_v0  ;;  %v1191_v25 = vadd.f32 %v1159_v63, %v1092_v27  ;;  %v896_v58 = vadd.f32 %v864_v51, %v797_v43 }
  0xd9   : > { %545 = vst.msk [vmem:[#allocation2 + $0x81] sm:$0xff] %vm289_vm1, %v512_v62  ;;  %v1258_v8 = vmul.f32 %v2228_v10, %v2338_v61  ;;  %v1322_v18 = vld [vmem:[#allocation2 + $0x79] sm:$0xff]  ;;  %v962_v40 = vmul.f32 %v2206_v55, %v2338_v61  ;;  %v667_v21 = vmul.f32 %v2179_v37, %v2338_v61 }
  0xda   : > { %v1357_v35 = vmul.f32 %v2243_v22, %v1322_v18  ;;  %v1061_v0 = vmul.f32 %v2216_v1, %v1322_v18  ;;  %557 = vst.msk [vmem:[#allocation2 + $0x111] sm:$0xff] %vm289_vm1, %v524_v56  ;;  %v766_v23 = vmul.f32 %v2184_v38, %v1322_v18 }
  0xdb   : > { %v1290_v26 = vadd.f32 %v1258_v8, %v1190_v13  ;;  %v994_v50 = vadd.f32 %v962_v40, %v895_v42 }
  0xdc   : > { %v437_v17 = vpop.f32.mrf.mxu0  ;;  %v473_v9 = vpop.f32.mrf.mxu2  ;;  %v798_v39 = vadd.f32 %v766_v23, %v667_v21 }
  0xdd   : > { %v438_v24 = vadd.f32 %v2143_v29, %v437_v17  ;;  %1898 = vmatmul.msk.f32.gmra.mxu1 %vm289_vm1, %v1487_v12  ;;  %v1389_v20 = vadd.f32 %v1357_v35, %v1290_v26  ;;  %v1093_v5 = vadd.f32 %v1061_v0, %v994_v50  ;;  %v474_v14 = vadd.f32 %v2143_v29, %v473_v9 }
  0xdf   : > { %v513_v34 = vmax.f32 %v438_v24, 0.0  ;;  %v525_v28 = vmax.f32 %v474_v14, 0.0 }
  0xe0   : > { %v1421_v19 = vld [vmem:[#allocation2 + $0x7a] sm:$0xff]  ;;  %v1422_v57 = vld [vmem:[#allocation2 + $0x82] sm:$0xff] }
  0xe1   : > { %v1224_v7 = vld [vmem:[#allocation2 + $0x80] sm:$0xff]  ;;  %546 = vst.msk [vmem:[#allocation2 + $0x91] sm:$0xff] %vm289_vm1, %v513_v34  ;;  %v1456_v16 = vmul.f32 %v2251_v32, %v1421_v19  ;;  %v1160_v3 = vmul.f32 %v2221_v2, %v1421_v19  ;;  %v1457_v4 = vmul.f32 %v2251_v32, %v1422_v57  ;;  %v865_v30 = vmul.f32 %v2197_v45, %v1421_v19 }
  0xe2   : > { %v1259_v36 = vmul.f32 %v2228_v10, %v1224_v7  ;;  %v1323_v41 = vld [vmem:[#allocation2 + $0x81] sm:$0xff]  ;;  %v963_v54 = vmul.f32 %v2206_v55, %v1224_v7  ;;  %v668_v31 = vmul.f32 %v2179_v37, %v1224_v7  ;;  %v1161_v61 = vmul.f32 %v2221_v2, %v1422_v57  ;;  %558 = vst.msk [vmem:[#allocation2 + $0x121] sm:$0xff] %vm289_vm1, %v525_v28 }
  0xe3   : > { %v1488_v46 = vadd.f32 %v1456_v16, %v1389_v20  ;;  %v1358_v53 = vmul.f32 %v2243_v22, %v1323_v41  ;;  %v1192_v12 = vadd.f32 %v1160_v3, %v1093_v5  ;;  %v1062_v13 = vmul.f32 %v2216_v1, %v1323_v41 }
  0xe4   : > { %v1291_v47 = vadd.f32 %v1259_v36, %v1191_v25  ;;  %v440_v49 = vpop.f32.mrf.mxu0  ;;  %v995_v8 = vadd.f32 %v963_v54, %v896_v58  ;;  %v767_v33 = vmul.f32 %v2184_v38, %v1323_v41  ;;  %v897_v36 = vadd.f32 %v865_v30, %v798_v39  ;;  %v476_v42 = vpop.f32.mrf.mxu2 }
  0xe5   : > { %v441_v52 = vadd.f32 %v2143_v29, %v440_v49  ;;  %1899 = vmatmul.msk.f32.gmra.mxu1 %vm289_vm1, %v1488_v46  ;;  %v477_v46 = vadd.f32 %v2143_v29, %v476_v42  ;;  %v866_v49 = vmul.f32 %v2197_v45, %v1422_v57 }
  0xe6   : > { %v1390_v62 = vadd.f32 %v1358_v53, %v1291_v47  ;;  %v1094_v27 = vadd.f32 %v1062_v13, %v995_v8  ;;  %v799_v41 = vadd.f32 %v767_v33, %v668_v31 }
  0xe7   : > { %v514_v60 = vmax.f32 %v441_v52, 0.0  ;;  %v526_v53 = vmax.f32 %v477_v46, 0.0 }
  0xe8   : > { %v2371_v59 = vld [vmem:[#allocation2 + $0x90] sm:$0xff]  ;;  %v1489_v11 = vadd.f32 %v1457_v4, %v1390_v62  ;;  %v1193_v20 = vadd.f32 %v1161_v61, %v1094_v27  ;;  %v898_v56 = vadd.f32 %v866_v49, %v799_v41 }
  0xe9   : > { %547 = vst.msk [vmem:[#allocation2 + $0x99] sm:$0xff] %vm289_vm1, %v514_v60  ;;  %v1260_v6 = vmul.f32 %v2228_v10, %v2371_v59  ;;  %v1324_v17 = vld [vmem:[#allocation2 + $0x91] sm:$0xff]  ;;  %v964_v40 = vmul.f32 %v2206_v55, %v2371_v59  ;;  %v669_v21 = vmul.f32 %v2179_v37, %v2371_v59 }
  0xea   : > { %v1359_v35 = vmul.f32 %v2243_v22, %v1324_v17  ;;  %v1063_v62 = vmul.f32 %v2216_v1, %v1324_v17  ;;  %559 = vst.msk [vmem:[#allocation2 + $0x129] sm:$0xff] %vm289_vm1, %v526_v53  ;;  %v768_v23 = vmul.f32 %v2184_v38, %v1324_v17 }
  0xeb   : > { %v1292_v26 = vadd.f32 %v1260_v6, %v1192_v12  ;;  %v996_v48 = vadd.f32 %v964_v40, %v897_v36 }
  0xec   : > { %v443_v15 = vpop.f32.mrf.mxu0  ;;  %v479_v8 = vpop.f32.mrf.mxu2 }
  0xed   : > { %v444_v24 = vadd.f32 %v2143_v29, %v443_v15  ;;  %1900 = vmatmul.msk.f32.gmra.mxu1 %vm289_vm1, %v1489_v11  ;;  %v1391_v19 = vadd.f32 %v1359_v35, %v1292_v26  ;;  %v1095_v4 = vadd.f32 %v1063_v62, %v996_v48  ;;  %v480_v13 = vadd.f32 %v2143_v29, %v479_v8 }
  0xef   : > { %v515_v34 = vmax.f32 %v444_v24, 0.0  ;;  %v527_v31 = vmax.f32 %v480_v13, 0.0 }
  0xf0   : > { %v1423_v18 = vld [vmem:[#allocation2 + $0x92] sm:$0xff]  ;;  %v1424_v54 = vld [vmem:[#allocation2 + $0x9a] sm:$0xff] }
  0xf1   : > { %v1226_v63 = vld [vmem:[#allocation2 + $0x98] sm:$0xff]  ;;  %548 = vst.msk [vmem:[#allocation2 + $0xa9] sm:$0xff] %vm289_vm1, %v515_v34  ;;  %v1458_v7 = vmul.f32 %v2251_v32, %v1423_v18  ;;  %v1162_v0 = vmul.f32 %v2221_v2, %v1423_v18  ;;  %v1459_v3 = vmul.f32 %v2251_v32, %v1424_v54  ;;  %v867_v33 = vmul.f32 %v2197_v45, %v1423_v18 }
  0xf2   : > { %v1261_v16 = vmul.f32 %v2228_v10, %v1226_v63  ;;  %v1325_v25 = vld [vmem:[#allocation2 + $0x99] sm:$0xff]  ;;  %v965_v52 = vmul.f32 %v2206_v55, %v1226_v63  ;;  %v670_v24 = vmul.f32 %v2179_v37, %v1226_v63  ;;  %v1163_v59 = vmul.f32 %v2221_v2, %v1424_v54  ;;  %560 = vst.msk [vmem:[#allocation2 + $0x139] sm:$0xff] %vm289_vm1, %v527_v31 }
  0xf3   : > { %v1490_v43 = vadd.f32 %v1458_v7, %v1391_v19  ;;  %v1360_v51 = vmul.f32 %v2243_v22, %v1325_v25  ;;  %v1194_v11 = vadd.f32 %v1162_v0, %v1095_v4  ;;  %v1064_v12 = vmul.f32 %v2216_v1, %v1325_v25 }
  0xf4   : > { %v1293_v44 = vadd.f32 %v1261_v16, %v1193_v20  ;;  %v446_v47 = vpop.f32.mrf.mxu0  ;;  %v997_v6 = vadd.f32 %v965_v52, %v898_v56  ;;  %v769_v26 = vmul.f32 %v2184_v38, %v1325_v25  ;;  %v800_v63 = vadd.f32 %v768_v23, %v669_v21  ;;  %v935_v16 = vld [vmem:[#allocation2 + $0xd8] sm:$0xff] }
  0xf5   : > { %v447_v50 = vadd.f32 %v2143_v29, %v446_v47  ;;  %1901 = vmatmul.msk.f32.gmra.mxu1 %vm289_vm1, %v1490_v43  ;;  %v1034_v25 = vld [vmem:[#allocation2 + $0xd9] sm:$0xff]  ;;  %v868_v42 = vmul.f32 %v2197_v45, %v1424_v54  ;;  %v482_v43 = vpop.f32.mrf.mxu2 }
  0xf6   : > { %v1392_v60 = vadd.f32 %v1360_v51, %v1293_v44  ;;  %v1096_v30 = vadd.f32 %v1064_v12, %v997_v6  ;;  %v801_v40 = vadd.f32 %v769_v26, %v670_v24  ;;  %v899_v41 = vadd.f32 %v867_v33, %v800_v63  ;;  %v2460_v33 = vld [vmem:[#allocation2 + $0xe0] sm:$0xff] }
  0xf7   : > { %v516_v58 = vmax.f32 %v447_v50, 0.0  ;;  %v483_v48 = vadd.f32 %v2143_v29, %v482_v43  ;;  %v675_v51 = vmul.f32 %v2179_v37, %v935_v16  ;;  %v774_v52 = vmul.f32 %v2184_v38, %v1034_v25 }
  0xf8   : > { %v1227_v57 = vld [vmem:[#allocation2 + $0xa8] sm:$0xff]  ;;  %v1491_v9 = vadd.f32 %v1459_v3, %v1392_v60  ;;  %v1195_v20 = vadd.f32 %v1163_v59, %v1096_v30  ;;  %v900_v54 = vadd.f32 %v868_v42, %v801_v40  ;;  %v2466_v40 = vld [vmem:[#allocation2 + $0xf1] sm:$0xff]  ;;  %v2478_v43 = vmul.f32 %v2243_v22, %v1034_v25 }
  0xf9   : > { %549 = vst.msk [vmem:[#allocation2 + $0xb1] sm:$0xff] %vm289_vm1, %v516_v58  ;;  %v1262_v5 = vmul.f32 %v2228_v10, %v1227_v57  ;;  %v1326_v15 = vld [vmem:[#allocation2 + $0xa9] sm:$0xff]  ;;  %v966_v39 = vmul.f32 %v2206_v55, %v1227_v57  ;;  %v2432_v58 = vld [vmem:[#allocation2 + $0xda] sm:$0xff]  ;;  %v528_v60 = vmax.f32 %v483_v48, 0.0  ;;  %v671_v4 = vmul.f32 %v2179_v37, %v1227_v57 }
  0xfa   : > { %v1361_v35 = vmul.f32 %v2243_v22, %v1326_v15  ;;  %v1065_v0 = vmul.f32 %v2216_v1, %v1326_v15  ;;  %v2449_v21 = vmul.f32 %v2221_v2, %v2432_v58  ;;  %v2452_v57 = vmul.f32 %v2228_v10, %v935_v16 }
  0xfb   : > { %v1294_v28 = vadd.f32 %v1262_v5, %v1194_v11  ;;  %v998_v50 = vadd.f32 %v966_v39, %v899_v41  ;;  %v770_v5 = vmul.f32 %v2184_v38, %v1326_v15  ;;  %v2441_v11 = vmul.f32 %v2206_v55, %v935_v16  ;;  %561 = vst.msk [vmem:[#allocation2 + $0x141] sm:$0xff] %vm289_vm1, %v528_v60  ;;  %v2464_v39 = vld [vmem:[#allocation2 + $0xf0] sm:$0xff] }
  0xfc   : > { %v449_v14 = vpop.f32.mrf.mxu0  ;;  %v972_v48 = vmul.f32 %v2206_v55, %v2464_v39 }
  0xfd   : > { %v450_v27 = vadd.f32 %v2143_v29, %v449_v14  ;;  %1902 = vmatmul.msk.f32.gmra.mxu1 %vm289_vm1, %v1491_v9  ;;  %v1393_v19 = vadd.f32 %v1361_v35, %v1294_v28  ;;  %v1097_v12 = vadd.f32 %v1065_v0, %v998_v50  ;;  %v2445_v14 = vmul.f32 %v2216_v1, %v1034_v25 }
  0xfe   : > { %v802_v30 = vadd.f32 %v770_v5, %v671_v4  ;;  %v873_v35 = vmul.f32 %v2197_v45, %v2432_v58 }
  0xff   : > { %v517_v34 = vmax.f32 %v450_v27, 0.0  ;;  %v806_v27 = vadd.f32 %v774_v52, %v675_v51  ;;  %v676_v51 = vmul.f32 %v2179_v37, %v2460_v33 }
 0x100   : > { %v1425_v17 = vld [vmem:[#allocation2 + $0xaa] sm:$0xff]  ;;  %v2434_v62 = vld [vmem:[#allocation2 + $0xb2] sm:$0xff] }
 0x101   : > { %v1228_v61 = vld [vmem:[#allocation2 + $0xb0] sm:$0xff]  ;;  %550 = vst.msk [vmem:[#allocation2 + $0xc1] sm:$0xff] %vm289_vm1, %v517_v34  ;;  %v1460_v7 = vmul.f32 %v2251_v32, %v1425_v17  ;;  %v1164_v3 = vmul.f32 %v2221_v2, %v1425_v17  ;;  %v1461_v15 = vmul.f32 %v2251_v32, %v2434_v62  ;;  %v869_v31 = vmul.f32 %v2197_v45, %v1425_v17  ;;  %v485_v34 = vpop.f32.mrf.mxu2 }
 0x102   : > { %v1263_v18 = vmul.f32 %v2228_v10, %v1228_v61  ;;  %v1327_v36 = vld [vmem:[#allocation2 + $0xb1] sm:$0xff]  ;;  %v967_v47 = vmul.f32 %v2206_v55, %v1228_v61  ;;  %v905_v25 = vadd.f32 %v873_v35, %v806_v27  ;;  %v870_v35 = vmul.f32 %v2197_v45, %v2434_v62 }
 0x103   : > { %v1492_v44 = vadd.f32 %v1460_v7, %v1393_v19  ;;  %v1362_v56 = vmul.f32 %v2243_v22, %v1327_v36  ;;  %v1066_v26 = vmul.f32 %v2216_v1, %v1327_v36  ;;  %v1196_v28 = vadd.f32 %v1164_v3, %v1097_v12 }
 0x104   : > { %v1295_v46 = vadd.f32 %v1263_v18, %v1195_v20  ;;  %v452_v49 = vpop.f32.mrf.mxu0  ;;  %v999_v9 = vadd.f32 %v967_v47, %v900_v54  ;;  %v486_v19 = vadd.f32 %v2143_v29, %v485_v34  ;;  %v672_v7 = vmul.f32 %v2179_v37, %v1228_v61  ;;  %v2472_v18 = vld [vmem:[#allocation2 + $0xf2] sm:$0xff]  ;;  %v2507_v34 = vld [vmem:[#allocation2 + $0xe2] sm:$0xff] }
 0x105   : > { %v453_v53 = vadd.f32 %v2143_v29, %v452_v49  ;;  %1903 = vmatmul.msk.f32.gmra.mxu1 %vm289_vm1, %v1492_v44  ;;  %v771_v41 = vmul.f32 %v2184_v38, %v1327_v36  ;;  %v971_v44 = vmul.f32 %v2206_v55, %v2460_v33  ;;  %v901_v47 = vadd.f32 %v869_v31, %v802_v30  ;;  %v2505_v31 = vld [vmem:[#allocation2 + $0xe1] sm:$0xff] }
 0x106   : > { %v1394_v8 = vadd.f32 %v1362_v56, %v1295_v46  ;;  %v1098_v63 = vadd.f32 %v1066_v26, %v999_v9  ;;  %v529_v61 = vmax.f32 %v486_v19, 0.0  ;;  %v1165_v46 = vmul.f32 %v2221_v2, %v2434_v62 }
 0x107   : > { %v518_v6 = vmax.f32 %v453_v53, 0.0  ;;  %v2488_v36 = vmul.f32 %v2216_v1, %v2466_v40  ;;  %v2494_v50 = vmul.f32 %v2221_v2, %v2472_v18  ;;  %v803_v3 = vadd.f32 %v771_v41, %v672_v7 }
 0x108   : > { %v1229_v13 = vld [vmem:[#allocation2 + $0xc0] sm:$0xff]  ;;  %v1493_v59 = vadd.f32 %v1461_v15, %v1394_v8  ;;  %562 = vst.msk [vmem:[#allocation2 + $0x151] sm:$0xff] %vm289_vm1, %v529_v61  ;;  %v1197_v53 = vadd.f32 %v1165_v46, %v1098_v63  ;;  %v775_v62 = vmul.f32 %v2184_v38, %v2505_v31  ;;  %v874_v61 = vmul.f32 %v2197_v45, %v2507_v34 }
 0x109   : > { %551 = vst.msk [vmem:[#allocation2 + $0xc9] sm:$0xff] %vm289_vm1, %v518_v6  ;;  %v1264_v23 = vmul.f32 %v2228_v10, %v1229_v13  ;;  %v1328_v24 = vld [vmem:[#allocation2 + $0xc1] sm:$0xff]  ;;  %v673_v20 = vmul.f32 %v2179_v37, %v1229_v13  ;;  %v968_v16 = vmul.f32 %v2206_v55, %v1229_v13  ;;  %v488_v26 = vpop.f32.mrf.mxu2 }
 0x10a   : > { %v772_v17 = vmul.f32 %v2184_v38, %v1328_v24  ;;  %v1363_v49 = vmul.f32 %v2243_v22, %v1328_v24  ;;  %v1067_v12 = vmul.f32 %v2216_v1, %v1328_v24 }
 0x10b   : > { %v1296_v42 = vadd.f32 %v1264_v23, %v1196_v28  ;;  %v1000_v0 = vadd.f32 %v968_v16, %v901_v47  ;;  %v489_v16 = vadd.f32 %v2143_v29, %v488_v26  ;;  %v1169_v29 = vmul.f32 %v2221_v2, %v2507_v34  ;;  %v1333_v26 = vld [vmem:[#allocation2 + $0xf9] sm:$0xff] }
 0x10c   : > { %v804_v60 = vadd.f32 %v772_v17, %v673_v20  ;;  %v902_v17 = vadd.f32 %v870_v35, %v803_v3  ;;  %v1368_v35 = vmul.f32 %v2243_v22, %v1333_v26 }
 0x10d   : > { %1904 = vmatmul.msk.f32.gmra.mxu1 %vm289_vm1, %v1493_v59  ;;  %v1395_v4 = vadd.f32 %v1363_v49, %v1296_v42  ;;  %v1099_v59 = vadd.f32 %v1067_v12, %v1000_v0 }
 0x110   : > { %v1427_v52 = vld [vmem:[#allocation2 + $0xc2] sm:$0xff]  ;;  %v1428_v8 = vld [vmem:[#allocation2 + $0xca] sm:$0xff] }
 0x111   : > { %v1230_v56 = vld [vmem:[#allocation2 + $0xc8] sm:$0xff]  ;;  %v1462_v5 = vmul.f32 %v2251_v32, %v1427_v52  ;;  %v871_v9 = vmul.f32 %v2197_v45, %v1427_v52  ;;  %v1166_v13 = vmul.f32 %v2221_v2, %v1427_v52  ;;  %v872_v24 = vmul.f32 %v2197_v45, %v1428_v8 }
 0x112   : > { %v1329_v54 = vld [vmem:[#allocation2 + $0xc9] sm:$0xff]  ;;  %v1265_v6 = vmul.f32 %v2228_v10, %v1230_v56  ;;  %v674_v15 = vmul.f32 %v2179_v37, %v1230_v56  ;;  %v969_v19 = vmul.f32 %v2206_v55, %v1230_v56  ;;  %v530_v52 = vmax.f32 %v489_v16, 0.0 }
 0x113   : > { %v773_v23 = vmul.f32 %v2184_v38, %v1329_v54  ;;  %v1494_v27 = vadd.f32 %v1462_v5, %v1395_v4  ;;  %v903_v30 = vadd.f32 %v871_v9, %v804_v60  ;;  %v1364_v7 = vmul.f32 %v2243_v22, %v1329_v54  ;;  %v1234_v9 = vld [vmem:[#allocation2 + $0xf8] sm:$0xff]  ;;  %v1334_v16 = vld [vmem:[#allocation2 + $0x109] sm:$0xff] }
 0x114   : > { %v1297_v28 = vadd.f32 %v1265_v6, %v1197_v53  ;;  %v1198_v41 = vadd.f32 %v1166_v13, %v1099_v59  ;;  %v1001_v49 = vadd.f32 %v969_v19, %v902_v17  ;;  %v1004_v56 = vadd.f32 %v972_v48, %v905_v25  ;;  %563 = vst.msk [vmem:[#allocation2 + $0x159] sm:$0xff] %vm289_vm1, %v530_v52  ;;  %v491_v6 = vpop.f32.mrf.mxu2 }
 0x115   : > { %v805_v63 = vadd.f32 %v773_v23, %v674_v15  ;;  %1905 = vmatmul.msk.f32.gmra.mxu1 %vm289_vm1, %v1494_v27  ;;  %v1002_v20 = vadd.f32 %v2441_v11, %v903_v30  ;;  %v1070_v11 = vmul.f32 %v2216_v1, %v2505_v31  ;;  %v1463_v60 = vmul.f32 %v2251_v32, %v1428_v8 }
 0x116   : > { %v1396_v46 = vadd.f32 %v1364_v7, %v1297_v28  ;;  %v1268_v45 = vmul.f32 %v2228_v10, %v2464_v39  ;;  %v1068_v3 = vmul.f32 %v2216_v1, %v1329_v54  ;;  %v807_v5 = vadd.f32 %v775_v62, %v676_v51 }
 0x117   : > { %v904_v42 = vadd.f32 %v872_v24, %v805_v63  ;;  %v1101_v47 = vadd.f32 %v2445_v14, %v1002_v20  ;;  %v1367_v14 = vmul.f32 %v2243_v22, %v2466_v40  ;;  %v1466_v13 = vmul.f32 %v2251_v32, %v2472_v18  ;;  %v2554_v20 = vld [vmem:[#allocation2 + $0x108] sm:$0xff] }
 0x118   : > { %v1495_v48 = vadd.f32 %v1463_v60, %v1396_v46  ;;  %v1100_v12 = vadd.f32 %v1068_v3, %v1001_v49  ;;  %v677_v51 = vmul.f32 %v2179_v37, %v2464_v39  ;;  %v1167_v27 = vmul.f32 %v2221_v2, %v1428_v8  ;;  %v1433_v3 = vld [vmem:[#allocation2 + $0x10a] sm:$0xff] }
 0x119   : > { %v1003_v53 = vadd.f32 %v971_v44, %v904_v42  ;;  %v1200_v0 = vadd.f32 %v2449_v21, %v1101_v47  ;;  %v1298_v44 = vadd.f32 %v2452_v57, %v1198_v41  ;;  %v2538_v21 = vld [vmem:[%s2877_s2] ss:$0 sm:$0xff]  ;;  %v1269_v57 = vmul.f32 %v2228_v10, %v1234_v9 }
 0x11a   : > { %v492_v54 = vadd.f32 %v2538_v21, %v491_v6  ;;  %v776_v30 = vmul.f32 %v2184_v38, %v2466_v40  ;;  %v1103_v59 = vadd.f32 %v2488_v36, %v1004_v56  ;;  %v906_v63 = vadd.f32 %v874_v61, %v807_v5  ;;  %v2608_v5 = vld [vmem:[%s2878_s3 + $0x4] ss:$0 sm:$0xff] }
 0x11b   : > { %v1102_v4 = vadd.f32 %v1070_v11, %v1003_v53  ;;  %v1300_v25 = vadd.f32 %v1268_v45, %v1200_v0  ;;  %v973_v24 = vmul.f32 %v2206_v55, %v1234_v9  ;;  %v1397_v37 = vadd.f32 %v2478_v43, %v1298_v44  ;;  %v2565_v55 = vld [vmem:[%s2878_s3 + $0x2] ss:$0 sm:$0xff]  ;;  %v2590_v11 = vld [vmem:[%s2878_s3] ss:$0 sm:$0xff] }
 0x11c   : > { %v531_v28 = vmax.f32 %v492_v54, 0.0  ;;  %v1199_v7 = vadd.f32 %v1167_v27, %v1100_v12  ;;  %v1464_v38 = vmul.f32 %v2251_v32, %v2432_v58  ;;  %v1267_v40 = vmul.f32 %v2228_v10, %v2460_v33  ;;  %v1432_v33 = vld [vmem:[#allocation2 + $0xfa] sm:$0xff]  ;;  %v494_v46 = vpop.f32.mrf.mxu2 }
 0x11d   : > { %v1201_v15 = vadd.f32 %v1169_v29, %v1102_v4  ;;  %1906 = vmatmul.msk.f32.gmra.mxu1 %vm289_vm1, %v1495_v48  ;;  %v1399_v23 = vadd.f32 %v1367_v14, %v1300_v25  ;;  %v808_v36 = vadd.f32 %v776_v30, %v677_v51  ;;  %v875_v43 = vmul.f32 %v2565_v55, %v2472_v18  ;;  %v2599_v14 = vld [vmem:[#allocation2 + $0x110] sm:$0xff]  ;;  %v2630_v30 = vld [vmem:[#allocation2 + $0x120] sm:$0xff] }
 0x11e   : > { %564 = vst.msk [vmem:[#allocation2 + $0x169] sm:$0xff] %vm289_vm1, %v531_v28  ;;  %v1202_v8 = vadd.f32 %v2494_v50, %v1103_v59  ;;  %v1270_v17 = vmul.f32 %v2228_v10, %v2554_v20  ;;  %v1072_v58 = vmul.f32 %v2216_v1, %v1333_v26  ;;  %v1496_v41 = vadd.f32 %v1464_v38, %v1397_v37  ;;  %v2582_v1 = vld [vmem:[%s2878_s3 + $0x3] ss:$0 sm:$0xff]  ;;  %v1335_v51 = vld [vmem:[#allocation2 + $0x111] sm:$0xff]  ;;  %v2638_v37 = vld [vmem:[%s2880_s5] ss:$0 sm:$0xff] }
 0x11f   : > { %v1498_v19 = vadd.f32 %v1466_v13, %v1399_v23  ;;  %v1301_v39 = vadd.f32 %v1269_v57, %v1201_v15  ;;  %v1299_v62 = vadd.f32 %v1267_v40, %v1199_v7  ;;  %v1005_v61 = vadd.f32 %v973_v24, %v906_v63  ;;  %v2643_v7 = vld [vmem:[%s2878_s3 + $0x7] ss:$0 sm:$0xff]  ;;  %v1434_v40 = vld [vmem:[#allocation2 + $0x112] sm:$0xff] }
 0x120   : > { %v1366_v47 = vmul.f32 %v2243_v22, %v2505_v31  ;;  %v495_v49 = vadd.f32 %v2538_v21, %v494_v46  ;;  %v1467_v18 = vmul.f32 %v2251_v32, %v1432_v33  ;;  %v1369_v10 = vmul.f32 %v2243_v22, %v1334_v16  ;;  %v2596_v22 = vld [vmem:[%s2878_s3 + $0x1] ss:$0 sm:$0xff] }
 0x121   : > { %1909 = vmatmul.msk.f32.vlgmr.msra.gmra.mxu3 %vm289_vm1, %v1498_v19  ;;  %v1400_v42 = vadd.f32 %v1368_v35, %v1301_v39  ;;  %v907_v50 = vadd.f32 %v875_v43, %v808_v36  ;;  %v974_v52 = vmul.f32 %v2582_v1, %v2554_v20  ;;  %v1171_v53 = vmul.f32 %v2221_v2, %v1432_v33 }
 0x122   : > { %v532_v31 = vmax.f32 %v495_v49, 0.0  ;;  %v678_v29 = vmul.f32 %v2590_v11, %v1234_v9  ;;  %v777_v56 = vmul.f32 %v2596_v22, %v1333_v26  ;;  %v1398_v0 = vadd.f32 %v1366_v47, %v1299_v62  ;;  %v2625_v26 = vld [vmem:[%s2878_s3 + $0x5] ss:$0 sm:$0xff]  ;;  %v2656_v62 = vld [vmem:[%s2878_s3 + $0x8] ss:$0 sm:$0xff] }
 0x123   : > { %v1499_v60 = vadd.f32 %v1467_v18, %v1400_v42  ;;  %v1302_v45 = vadd.f32 %v1270_v17, %v1202_v8  ;;  %v1104_v2 = vadd.f32 %v1072_v58, %v1005_v61  ;;  %v1465_v44 = vmul.f32 %v2251_v32, %v2507_v34  ;;  %v2616_v34 = vld [vmem:[%s2878_s3 + $0x6] ss:$0 sm:$0xff] }
 0x124   : > { %565 = vst.msk [vmem:[#allocation2 + $0x171] sm:$0xff] %vm289_vm1, %v532_v31  ;;  %v1006_v4 = vadd.f32 %v974_v52, %v907_v50  ;;  %v1073_v6 = vmul.f32 %v2608_v5, %v1334_v16  ;;  %v1468_v48 = vmul.f32 %v2251_v32, %v1433_v3  ;;  %v809_v25 = vadd.f32 %v777_v56, %v678_v29  ;;  %v497_v57 = vpop.f32.mrf.mxu2  ;;  %v1336_v8 = vld [vmem:[#allocation2 + $0x121] sm:$0xff] }
 0x125   : > { %1907 = vmatmul.msk.f32.gmra.mxu1 %vm289_vm1, %v1496_v41  ;;  %v876_v9 = vmul.f32 %v2565_v55, %v1432_v33  ;;  %v1497_v12 = vadd.f32 %v1465_v44, %v1398_v0  ;;  %v1401_v54 = vadd.f32 %v1369_v10, %v1302_v45  ;;  %v1203_v13 = vadd.f32 %v1171_v53, %v1104_v2  ;;  %v1435_v52 = vld [vmem:[#allocation2 + $0x122] sm:$0xff] }
 0x126   : > { %v1271_v15 = vmul.f32 %v2616_v34, %v2599_v14  ;;  %v498_v23 = vadd.f32 %v2538_v21, %v497_v57  ;;  %v1105_v32 = vadd.f32 %v1073_v6, %v1006_v4  ;;  %v1172_v27 = vmul.f32 %v2625_v26, %v1433_v3  ;;  %v1238_v31 = vld [vmem:[#allocation2 + $0x128] sm:$0xff] }
 0x127   : > { %v975_v28 = vmul.f32 %v2582_v1, %v2599_v14  ;;  %v908_v35 = vadd.f32 %v876_v9, %v809_v25  ;;  %v679_v63 = vmul.f32 %v2590_v11, %v2554_v20  ;;  %v778_v24 = vmul.f32 %v2596_v22, %v1334_v16 }
 0x128   : > { %v533_v59 = vmax.f32 %v498_v23, 0.0  ;;  %v1500_v19 = vadd.f32 %v1468_v48, %v1401_v54  ;;  %v1303_v39 = vadd.f32 %v1271_v15, %v1203_v13  ;;  %v1370_v38 = vmul.f32 %v2643_v7, %v1335_v51  ;;  %v1337_v48 = vld [vmem:[#allocation2 + $0x129] sm:$0xff] }
 0x129   : > { %1910 = vmatmul.msk.f32.gmra.mxu3 %vm289_vm1, %v1499_v60  ;;  %v1204_v20 = vadd.f32 %v1172_v27, %v1105_v32  ;;  %v1272_v36 = vmul.f32 %v2616_v34, %v2630_v30  ;;  %v1007_v17 = vadd.f32 %v975_v28, %v908_v35  ;;  %v1074_v16 = vmul.f32 %v2608_v5, %v1335_v51  ;;  %v1436_v23 = vld [vmem:[#allocation2 + $0x12a] sm:$0xff]  ;;  %v1239_v28 = vld [vmem:[#allocation2 + $0x138] sm:$0xff] }
 0x12a   : > { %566 = vst.msk [vmem:[#allocation2 + $0x181] sm:$0xff] %vm289_vm1, %v533_v59  ;;  %v810_v58 = vadd.f32 %v778_v24, %v679_v63  ;;  %v877_v41 = vmul.f32 %v2565_v55, %v1433_v3  ;;  %v1402_v33 = vadd.f32 %v1370_v38, %v1303_v39  ;;  %v1469_v61 = vmul.f32 %v2656_v62, %v1434_v40 }
 0x12b   : > { %v1304_v18 = vadd.f32 %v1272_v36, %v1204_v20  ;;  %v1371_v10 = vmul.f32 %v2643_v7, %v1336_v8  ;;  %v1173_v50 = vmul.f32 %v2625_v26, %v1434_v40  ;;  %v1106_v53 = vadd.f32 %v1074_v16, %v1007_v17  ;;  %v1338_v36 = vld [vmem:[#allocation2 + $0x139] sm:$0xff] }
 0x12c   : > { %v500_v46 = vpop.f32.mrf.mxu2  ;;  %v909_v29 = vadd.f32 %v877_v41, %v810_v58  ;;  %v976_v56 = vmul.f32 %v2582_v1, %v2630_v30  ;;  %v1501_v0 = vadd.f32 %v1469_v61, %v1402_v33  ;;  %v779_v45 = vmul.f32 %v2596_v22, %v1335_v51  ;;  %v1437_v33 = vld [vmem:[#allocation2 + $0x13a] sm:$0xff] }
 0x12d   : > { %1908 = vmatmul.msk.f32.gmra.mxu1 %vm289_vm1, %v1497_v12  ;;  %v501_v47 = vadd.f32 %v2538_v21, %v500_v46  ;;  %v680_v21 = vmul.f32 %v2590_v11, %v2599_v14  ;;  %v1470_v3 = vmul.f32 %v2656_v62, %v1435_v52  ;;  %v1273_v2 = vmul.f32 %v2616_v34, %v1238_v31 }
 0x12e   : > { %v1403_v4 = vadd.f32 %v1371_v10, %v1304_v18  ;;  %v1205_v6 = vadd.f32 %v1173_v50, %v1106_v53  ;;  %v1008_v25 = vadd.f32 %v976_v56, %v909_v29  ;;  %v1075_v9 = vmul.f32 %v2608_v5, %v1336_v8  ;;  %v1240_v10 = vld [vmem:[#allocation2 + $0x140] sm:$0xff] }
 0x12f   : > { %v534_v60 = vmax.f32 %v501_v47, 0.0  ;;  %v811_v12 = vadd.f32 %v779_v45, %v680_v21  ;;  %v878_v54 = vmul.f32 %v2565_v55, %v1434_v40  ;;  %v1372_v15 = vmul.f32 %v2643_v7, %v1337_v48 }
 0x130   : > { %v1502_v57 = vadd.f32 %v1470_v3, %v1403_v4  ;;  %v1305_v51 = vadd.f32 %v1273_v2, %v1205_v6  ;;  %v1107_v32 = vadd.f32 %v1075_v9, %v1008_v25  ;;  %v1174_v27 = vmul.f32 %v2625_v26, %v1435_v52  ;;  %v1438_v25 = vld [vmem:[#allocation2 + $0x142] sm:$0xff] }
 0x131   : > { %1911 = vmatmul.msk.f32.gmra.mxu3 %vm289_vm1, %v1500_v19  ;;  %567 = vst.msk [vmem:[#allocation2 + $0x189] sm:$0xff] %vm289_vm1, %v534_v60  ;;  %v910_v35 = vadd.f32 %v878_v54, %v811_v12  ;;  %v977_v59 = vmul.f32 %v2582_v1, %v1238_v31  ;;  %v681_v63 = vmul.f32 %v2590_v11, %v2630_v30 }
 0x132   : > { %v1635_v43 = vpop.f32.mrf.mxu1  ;;  %v780_v24 = vmul.f32 %v2596_v22, %v1336_v8  ;;  %v1471_v19 = vmul.f32 %v2656_v62, %v1436_v23  ;;  %v1404_v38 = vadd.f32 %v1372_v15, %v1305_v51  ;;  %v1206_v40 = vadd.f32 %v1174_v27, %v1107_v32  ;;  %v1241_v15 = vld [vmem:[#allocation2 + $0x150] sm:$0xff] }
 0x133   : > { %v1636_v42 = vadd.f32 %v2638_v37, %v1635_v43  ;;  %v1274_v20 = vmul.f32 %v2616_v34, %v1239_v28  ;;  %v1076_v43 = vmul.f32 %v2608_v5, %v1337_v48  ;;  %v1009_v16 = vadd.f32 %v977_v59, %v910_v35  ;;  %v1340_v35 = vld [vmem:[#allocation2 + $0x151] sm:$0xff] }
 0x134   : > { %v812_v58 = vadd.f32 %v780_v24, %v681_v63  ;;  %v879_v30 = vmul.f32 %v2565_v55, %v1435_v52  ;;  %v1373_v41 = vmul.f32 %v2643_v7, %v1338_v36  ;;  %v1175_v61 = vmul.f32 %v2625_v26, %v1436_v23 }
 0x135   : > { %v1731_v49 = vmax.f32 %v1636_v42, 0.0  ;;  %v1306_v42 = vadd.f32 %v1274_v20, %v1206_v40  ;;  %v682_v46 = vmul.f32 %v2590_v11, %v1238_v31  ;;  %v781_v47 = vmul.f32 %v2596_v22, %v1337_v48  ;;  %v1339_v31 = vld [vmem:[#allocation2 + $0x141] sm:$0xff] }
 0x136   : > { %v1108_v18 = vadd.f32 %v1076_v43, %v1009_v16  ;;  %v911_v50 = vadd.f32 %v879_v30, %v812_v58  ;;  %v978_v53 = vmul.f32 %v2582_v1, %v1239_v28  ;;  %v1472_v52 = vmul.f32 %v2656_v62, %v1437_v33 }
 0x137   : > { %1763 = vst.msk [vmem:[%s2664_s9] sm:$0xff] %vm289_vm1, %v1731_v49  ;;  %v1503_v49 = vadd.f32 %v1471_v19, %v1404_v38  ;;  %v1405_v56 = vadd.f32 %v1373_v41, %v1306_v42  ;;  %v1275_v60 = vmul.f32 %v2616_v34, %v1240_v10  ;;  %v880_v21 = vmul.f32 %v2565_v55, %v1436_v23  ;;  %v1242_v42 = vld [vmem:[#allocation2 + $0x158] sm:$0xff] }
 0x138   : > { %v1207_v3 = vadd.f32 %v1175_v61, %v1108_v18  ;;  %v1010_v2 = vadd.f32 %v978_v53, %v911_v50  ;;  %v1374_v6 = vmul.f32 %v2643_v7, %v1339_v31  ;;  %v1176_v9 = vmul.f32 %v2625_v26, %v1437_v33 }
 0x139   : > { %1912 = vmatmul.msk.f32.gmra.mxu3 %vm289_vm1, %v1501_v0  ;;  %v813_v0 = vadd.f32 %v781_v47, %v682_v46  ;;  %v1504_v48 = vadd.f32 %v1472_v52, %v1405_v56  ;;  %v979_v12 = vmul.f32 %v2582_v1, %v1240_v10  ;;  %v782_v51 = vmul.f32 %v2596_v22, %v1338_v36 }
 0x13a   : > { %v1638_v44 = vpop.f32.mrf.mxu1  ;;  %v1307_v54 = vadd.f32 %v1275_v60, %v1207_v3  ;;  %v1473_v23 = vmul.f32 %v2656_v62, %v1438_v25  ;;  %v1276_v27 = vmul.f32 %v2616_v34, %v1241_v15  ;;  %v1078_v63 = vmul.f32 %v2608_v5, %v1339_v31 }
 0x13b   : > { %v1639_v14 = vadd.f32 %v2638_v37, %v1638_v44  ;;  %v1077_v44 = vmul.f32 %v2608_v5, %v1338_v36  ;;  %v881_v24 = vmul.f32 %v2565_v55, %v1437_v33  ;;  %v1375_v20 = vmul.f32 %v2643_v7, %v1340_v35  ;;  %v1439_v36 = vld [vmem:[#allocation2 + $0x152] sm:$0xff] }
 0x13c   : > { %v1177_v43 = vmul.f32 %v2625_v26, %v1438_v25  ;;  %v684_v16 = vmul.f32 %v2590_v11, %v1240_v10  ;;  %v783_v58 = vmul.f32 %v2596_v22, %v1339_v31  ;;  %v1474_v61 = vmul.f32 %v2656_v62, %v1439_v36 }
 0x13d   : > { %v1732_v13 = vmax.f32 %v1639_v14, 0.0  ;;  %v912_v14 = vadd.f32 %v880_v21, %v813_v0  ;;  %v1277_v47 = vmul.f32 %v2616_v34, %v1242_v42  ;;  %v1079_v18 = vmul.f32 %v2608_v5, %v1340_v35  ;;  %v1440_v0 = vld [vmem:[#allocation2 + $0x15a] sm:$0xff] }
 0x13e   : > { %v815_v10 = vadd.f32 %v783_v58, %v684_v16  ;;  %v882_v50 = vmul.f32 %v2565_v55, %v1438_v25  ;;  %v685_v3 = vmul.f32 %v2590_v11, %v1241_v15  ;;  %v1243_v25 = vld [vmem:[#allocation2 + $0x168] sm:$0xff]  ;;  %v884_v16 = vmul.f32 %v2565_v55, %v1440_v0 }
 0x13f   : > { %1764 = vst.msk [vmem:[%s2664_s9 + $0x8] sm:$0xff] %vm289_vm1, %v1732_v13  ;;  %v1109_v13 = vadd.f32 %v1077_v44, %v1010_v2  ;;  %v1011_v59 = vadd.f32 %v979_v12, %v912_v14  ;;  %v784_v2 = vmul.f32 %v2596_v22, %v1340_v35 }
 0x140   : > { %v914_v21 = vadd.f32 %v882_v50, %v815_v10 }
 0x141   : > { %1913 = vmatmul.msk.f32.gmra.mxu3 %vm289_vm1, %v1502_v57  ;;  %v683_v57 = vmul.f32 %v2590_v11, %v1239_v28  ;;  %v1208_v28 = vadd.f32 %v1176_v9, %v1109_v13  ;;  %v1110_v41 = vadd.f32 %v1078_v63, %v1011_v59  ;;  %v1475_v9 = vmul.f32 %v2656_v62, %v1440_v0 }
 0x142   : > { %v1641_v39 = vpop.f32.mrf.mxu1  ;;  %v816_v13 = vadd.f32 %v784_v2, %v685_v3  ;;  %v1179_v59 = vmul.f32 %v2625_v26, %v1440_v0  ;;  %v982_v63 = vmul.f32 %v2582_v1, %v1243_v25  ;;  %v687_v0 = vmul.f32 %v2590_v11, %v1243_v25 }
 0x143   : > { %v1642_v17 = vadd.f32 %v2638_v37, %v1641_v39  ;;  %v1406_v39 = vadd.f32 %v1374_v6, %v1307_v54  ;;  %v814_v38 = vadd.f32 %v782_v51, %v683_v57 }
 0x145   : > { %v1733_v8 = vmax.f32 %v1642_v17, 0.0  ;;  %v980_v17 = vmul.f32 %v2582_v1, %v1241_v15  ;;  %v1505_v30 = vadd.f32 %v1473_v23, %v1406_v39  ;;  %v913_v33 = vadd.f32 %v881_v24, %v814_v38 }
 0x146   : > { %v883_v15 = vmul.f32 %v2565_v55, %v1439_v36 }
 0x147   : > { %1765 = vst.msk [vmem:[%s2664_s9 + $0x10] sm:$0xff] %vm289_vm1, %v1733_v8  ;;  %v1308_v8 = vadd.f32 %v1276_v27, %v1208_v28  ;;  %v1012_v56 = vadd.f32 %v980_v17, %v913_v33  ;;  %v1342_v27 = vld [vmem:[#allocation2 + $0x169] sm:$0xff]  ;;  %v686_v28 = vmul.f32 %v2590_v11, %v1242_v42 }
 0x148   : > { %v915_v39 = vadd.f32 %v883_v15, %v816_v13 }
 0x149   : > { %1914 = vmatmul.msk.f32.gmra.mxu3 %vm289_vm1, %v1503_v49  ;;  %v1341_v49 = vld [vmem:[#allocation2 + $0x159] sm:$0xff]  ;;  %v1407_v52 = vadd.f32 %v1375_v20, %v1308_v8  ;;  %v1111_v6 = vadd.f32 %v1079_v18, %v1012_v56  ;;  %v1343_v8 = vld [vmem:[#allocation2 + $0x171] sm:$0xff] }
 0x14a   : > { %v1644_v29 = vpop.f32.mrf.mxu1  ;;  %v1376_v31 = vmul.f32 %v2643_v7, %v1341_v49  ;;  %v1080_v54 = vmul.f32 %v2608_v5, %v1341_v49  ;;  %v785_v38 = vmul.f32 %v2596_v22, %v1341_v49  ;;  %v1378_v18 = vmul.f32 %v2643_v7, %v1343_v8 }
 0x14b   : > { %v1645_v45 = vadd.f32 %v2638_v37, %v1644_v29  ;;  %v1209_v29 = vadd.f32 %v1177_v43, %v1110_v41  ;;  %v1506_v44 = vadd.f32 %v1474_v61, %v1407_v52  ;;  %v1441_v43 = vld [vmem:[#allocation2 + $0x16a] sm:$0xff]  ;;  %v1014_v41 = vadd.f32 %v982_v63, %v915_v39 }
 0x14c   : > { %v817_v33 = vadd.f32 %v785_v38, %v686_v28  ;;  %v1082_v3 = vmul.f32 %v2608_v5, %v1343_v8 }
 0x14d   : > { %v1734_v4 = vmax.f32 %v1645_v45, 0.0  ;;  %v981_v45 = vmul.f32 %v2582_v1, %v1242_v42  ;;  %v1081_v42 = vmul.f32 %v2608_v5, %v1342_v27 }
 0x14e   : > { %v916_v56 = vadd.f32 %v884_v16, %v817_v33 }
 0x14f   : > { %1766 = vst.msk [vmem:[%s2664_s9 + $0x18] sm:$0xff] %vm289_vm1, %v1734_v4  ;;  %v1309_v4 = vadd.f32 %v1277_v47, %v1209_v29  ;;  %v1013_v12 = vadd.f32 %v981_v45, %v914_v21  ;;  %v1476_v47 = vmul.f32 %v2656_v62, %v1441_v43  ;;  %v1113_v52 = vadd.f32 %v1081_v42, %v1014_v41  ;;  %v1444_v41 = vld [vmem:[#allocation2 + $0x18a] sm:$0xff] }
 0x150   : > { %v1180_v29 = vmul.f32 %v2625_v26, %v1441_v43  ;;  %v786_v21 = vmul.f32 %v2596_v22, %v1342_v27 }
 0x151   : > { %1915 = vmatmul.msk.f32.gmra.mxu3 %vm289_vm1, %v1504_v48  ;;  %v1178_v48 = vmul.f32 %v2625_v26, %v1439_v36  ;;  %v1408_v51 = vadd.f32 %v1376_v31, %v1309_v4  ;;  %v1112_v24 = vadd.f32 %v1080_v54, %v1013_v12  ;;  %v1377_v36 = vmul.f32 %v2643_v7, %v1342_v27  ;;  %v1245_v31 = vld [vmem:[#allocation2 + $0x180] sm:$0xff] }
 0x152   : > { %v1647_v32 = vpop.f32.mrf.mxu1  ;;  %v1212_v4 = vadd.f32 %v1180_v29, %v1113_v52  ;;  %v818_v12 = vadd.f32 %v786_v21, %v687_v0  ;;  %v1443_v27 = vld [vmem:[#allocation2 + $0x182] sm:$0xff] }
 0x153   : > { %v1648_v19 = vadd.f32 %v2638_v37, %v1647_v32  ;;  %v1210_v23 = vadd.f32 %v1178_v48, %v1111_v6  ;;  %v1278_v32 = vmul.f32 %v2616_v34, %v1243_v25  ;;  %v1280_v6 = vmul.f32 %v2616_v34, %v1245_v31 }
 0x154   : > { %v885_v25 = vmul.f32 %v2565_v55, %v1441_v43  ;;  %v1182_v33 = vmul.f32 %v2625_v26, %v1443_v27 }
 0x155   : > { %v1735_v40 = vmax.f32 %v1648_v19, 0.0  ;;  %v1244_v19 = vld [vmem:[#allocation2 + $0x170] sm:$0xff]  ;;  %v1310_v20 = vadd.f32 %v1278_v32, %v1210_v23  ;;  %v1246_v32 = vld [vmem:[#allocation2 + $0x188] sm:$0xff] }
 0x156   : > { %v1279_v17 = vmul.f32 %v2616_v34, %v1244_v19  ;;  %v983_v10 = vmul.f32 %v2582_v1, %v1244_v19  ;;  %v688_v63 = vmul.f32 %v2590_v11, %v1244_v19  ;;  %v1281_v39 = vmul.f32 %v2616_v34, %v1246_v32 }
 0x157   : > { %1767 = vst.msk [vmem:[%s2664_s9 + $0x20] sm:$0xff] %vm289_vm1, %v1735_v40  ;;  %v1507_v40 = vadd.f32 %v1475_v9, %v1408_v51 }
 0x158   : > { %v1015_v48 = vadd.f32 %v983_v10, %v916_v56  ;;  %v1346_v56 = vld [vmem:[#allocation2 + $0x199] sm:$0xff] }
 0x159   : > { %1916 = vmatmul.msk.f32.gmra.mxu3 %vm289_vm1, %v1505_v30  ;;  %v1211_v30 = vadd.f32 %v1179_v59, %v1112_v24  ;;  %v984_v59 = vmul.f32 %v2582_v1, %v1245_v31  ;;  %v787_v24 = vmul.f32 %v2596_v22, %v1343_v8  ;;  %v1381_v0 = vmul.f32 %v2643_v7, %v1346_v56 }
 0x15a   : > { %v1650_v46 = vpop.f32.mrf.mxu1  ;;  %v1114_v23 = vadd.f32 %v1082_v3, %v1015_v48  ;;  %v1248_v3 = vld [vmem:[#allocation2 + $0x1a0] sm:$0xff] }
 0x15b   : > { %v1651_v53 = vadd.f32 %v2638_v37, %v1650_v46  ;;  %v1409_v46 = vadd.f32 %v1377_v36, %v1310_v20  ;;  %v1311_v50 = vadd.f32 %v1279_v17, %v1211_v30  ;;  %v1345_v17 = vld [vmem:[#allocation2 + $0x189] sm:$0xff]  ;;  %v819_v19 = vadd.f32 %v787_v24, %v688_v63 }
 0x15c   : > { %v1380_v8 = vmul.f32 %v2643_v7, %v1345_v17  ;;  %v1084_v10 = vmul.f32 %v2608_v5, %v1345_v17 }
 0x15d   : > { %v1736_v60 = vmax.f32 %v1651_v53, 0.0  ;;  %v1442_v53 = vld [vmem:[#allocation2 + $0x172] sm:$0xff] }
 0x15e   : > { %v1477_v45 = vmul.f32 %v2656_v62, %v1442_v53  ;;  %v1181_v13 = vmul.f32 %v2625_v26, %v1442_v53  ;;  %v886_v36 = vmul.f32 %v2565_v55, %v1442_v53 }
 0x15f   : > { %1768 = vst.msk [vmem:[%s2664_s9 + $0x28] sm:$0xff] %vm289_vm1, %v1736_v60  ;;  %v1508_v60 = vadd.f32 %v1476_v47, %v1409_v46  ;;  %v1247_v46 = vld [vmem:[#allocation2 + $0x198] sm:$0xff] }
 0x160   : > { %v1213_v20 = vadd.f32 %v1181_v13, %v1114_v23  ;;  %v918_v55 = vadd.f32 %v886_v36, %v819_v19  ;;  %v1282_v52 = vmul.f32 %v2616_v34, %v1247_v46  ;;  %v1446_v13 = vld [vmem:[#allocation2 + $0x1a2] sm:$0xff] }
 0x161   : > { %1917 = vmatmul.msk.f32.gmra.mxu3 %vm289_vm1, %v1506_v44  ;;  %v1410_v44 = vadd.f32 %v1378_v18, %v1311_v50  ;;  %v1479_v18 = vmul.f32 %v2656_v62, %v1444_v41 }
 0x162   : > { %v1653_v14 = vpop.f32.mrf.mxu1  ;;  %v1313_v30 = vadd.f32 %v1281_v39, %v1213_v20 }
 0x163   : > { %v1654_v57 = vadd.f32 %v2638_v37, %v1653_v14  ;;  %v1344_v14 = vld [vmem:[#allocation2 + $0x181] sm:$0xff]  ;;  %v1509_v15 = vadd.f32 %v1477_v45, %v1410_v44  ;;  %v1183_v45 = vmul.f32 %v2625_v26, %v1444_v41  ;;  %v1283_v44 = vmul.f32 %v2616_v34, %v1248_v3 }
 0x164   : > { %v1379_v51 = vmul.f32 %v2643_v7, %v1344_v14  ;;  %v1083_v11 = vmul.f32 %v2608_v5, %v1344_v14  ;;  %v1445_v5 = vld [vmem:[#allocation2 + $0x19a] sm:$0xff] }
 0x165   : > { %v1737_v35 = vmax.f32 %v1654_v57, 0.0  ;;  %v1312_v57 = vadd.f32 %v1280_v6, %v1212_v4  ;;  %v1480_v48 = vmul.f32 %v2656_v62, %v1445_v5  ;;  %v1347_v14 = vld [vmem:[#allocation2 + $0x1a1] sm:$0xff] }
 0x167   : > { %1769 = vst.msk [vmem:[%s2664_s9 + $0x30] sm:$0xff] %vm289_vm1, %v1737_v35  ;;  %v917_v35 = vadd.f32 %v885_v25, %v818_v12  ;;  %v1411_v38 = vadd.f32 %v1379_v51, %v1312_v57  ;;  %v1481_v51 = vmul.f32 %v2656_v62, %v1446_v13 }
 0x169   : > { %1918 = vmatmul.msk.f32.gmra.mxu3 %vm289_vm1, %v1507_v40  ;;  %v1478_v40 = vmul.f32 %v2656_v62, %v1443_v27  ;;  %v1016_v16 = vadd.f32 %v984_v59, %v917_v35 }
 0x16a   : > { %v1656_v58 = vpop.f32.mrf.mxu1 }
 0x16b   : > { %v1657_v61 = vadd.f32 %v2638_v37, %v1656_v58  ;;  %v1510_v58 = vadd.f32 %v1478_v40, %v1411_v38  ;;  %v1115_v42 = vadd.f32 %v1083_v11, %v1016_v16 }
 0x16d   : > { %v1738_v49 = vmax.f32 %v1657_v61, 0.0  ;;  %v985_v61 = vmul.f32 %v2582_v1, %v1246_v32  ;;  %v1214_v53 = vadd.f32 %v1182_v33, %v1115_v42 }
 0x16f   : > { %1770 = vst.msk [vmem:[%s2664_s9 + $0x38] sm:$0xff] %vm289_vm1, %v1738_v49  ;;  %v1412_v49 = vadd.f32 %v1380_v8, %v1313_v30  ;;  %v1017_v29 = vadd.f32 %v985_v61, %v918_v55  ;;  %v1314_v1 = vadd.f32 %v1282_v52, %v1214_v53 }
 0x171   : > { %1919 = vmatmul.msk.f32.gmra.mxu3 %vm289_vm1, %v1508_v60  ;;  %v1511_v31 = vadd.f32 %v1479_v18, %v1412_v49  ;;  %v1116_v21 = vadd.f32 %v1084_v10, %v1017_v29  ;;  %v1413_v6 = vadd.f32 %v1381_v0, %v1314_v1 }
 0x172   : > { %v1659_v2 = vpop.f32.mrf.mxu1 }
 0x173   : > { %v1660_v9 = vadd.f32 %v2638_v37, %v1659_v2  ;;  %v1512_v25 = vadd.f32 %v1480_v48, %v1413_v6 }
 0x175   : > { %v1739_v54 = vmax.f32 %v1660_v9, 0.0  ;;  %v1215_v9 = vadd.f32 %v1183_v45, %v1116_v21 }
 0x177   : > { %1771 = vst.msk [vmem:[%s2664_s9 + $0x40] sm:$0xff] %vm289_vm1, %v1739_v54  ;;  %v1315_v26 = vadd.f32 %v1283_v44, %v1215_v9  ;;  %v1382_v54 = vmul.f32 %v2643_v7, %v1347_v14 }
 0x179   : > { %1920 = vmatmul.msk.f32.gmra.mxu3 %vm289_vm1, %v1509_v15  ;;  %v1414_v57 = vadd.f32 %v1382_v54, %v1315_v26 }
 0x17a   : > { %v1662_v28 = vpop.f32.mrf.mxu1 }
 0x17b   : > { %v1663_v43 = vadd.f32 %v2638_v37, %v1662_v28  ;;  %v1513_v32 = vadd.f32 %v1481_v51, %v1414_v57 }
 0x17d   : > { %v1740_v22 = vmax.f32 %v1663_v43, 0.0 }
 0x17f   : > { %1772 = vst.msk [vmem:[%s2664_s9 + $0x48] sm:$0xff] %vm289_vm1, %v1740_v22 }
 0x181   : > { %1921 = vmatmul.msk.f32.gmra.mxu3 %vm289_vm1, %v1510_v58 }
 0x182   : > { %v1665_v47 = vpop.f32.mrf.mxu1 }
 0x183   : > { %v1666_v50 = vadd.f32 %v2638_v37, %v1665_v47 }
 0x185   : > { %v1741_v60 = vmax.f32 %v1666_v50, 0.0 }
 0x187   : > { %1773 = vst.msk [vmem:[%s2664_s9 + $0x50] sm:$0xff] %vm289_vm1, %v1741_v60 }
 0x189   : > { %1922 = vmatmul.msk.f32.gmra.mxu3 %vm289_vm1, %v1511_v31 }
 0x18a   : > { %v1668_v2 = vpop.f32.mrf.mxu1 }
 0x18b   : > { %v1669_v4 = vadd.f32 %v2638_v37, %v1668_v2 }
 0x18d   : > { %v1742_v12 = vmax.f32 %v1669_v4, 0.0 }
 0x18f   : > { %1774 = vst.msk [vmem:[%s2664_s9 + $0x58] sm:$0xff] %vm289_vm1, %v1742_v12 }
 0x191   : > { %1923 = vmatmul.msk.f32.gmra.mxu3 %vm289_vm1, %v1512_v25 }
 0x192   : > { %v1671_v34 = vpop.f32.mrf.mxu1 }
 0x193   : > { %v1672_v15 = vadd.f32 %v2638_v37, %v1671_v34 }
 0x195   : > { %v1743_v23 = vmax.f32 %v1672_v15, 0.0 }
 0x197   : > { %1775 = vst.msk [vmem:[%s2664_s9 + $0x60] sm:$0xff] %vm289_vm1, %v1743_v23 }
 0x199   : > { %1924 = vmatmul.msk.f32.gmra.mxu3 %vm289_vm1, %v1513_v32 }
 0x19a   : > { %v1674_v27 = vpop.f32.mrf.mxu1 }
 0x19b   : > { %v1675_v7 = vadd.f32 %v2638_v37, %v1674_v27 }
 0x19d   : > { %v1744_v35 = vmax.f32 %v1675_v7, 0.0 }
 0x19f   : > { %1776 = vst.msk [vmem:[%s2664_s9 + $0x68] sm:$0xff] %vm289_vm1, %v1744_v35 }
 0x1a2   : > { %v1677_v59 = vpop.f32.mrf.mxu1 }
 0x1a3   : > { %v1678_v63 = vadd.f32 %v2638_v37, %v1677_v59 }
 0x1a4   : > { %v1683_v24 = vpop.f32.mrf.mxu3 }
 0x1a5   : > { %v1745_v62 = vmax.f32 %v1678_v63, 0.0  ;;  %v1684_v39 = vadd.f32 %v2638_v37, %v1683_v24 }
 0x1a7   : > { %1777 = vst.msk [vmem:[%s2664_s9 + $0x70] sm:$0xff] %vm289_vm1, %v1745_v62  ;;  %v1747_v28 = vmax.f32 %v1684_v39, 0.0 }
 0x1a9   : > { %1779 = vst.msk [vmem:[%s2664_s9 + $0x80] sm:$0xff] %vm289_vm1, %v1747_v28 }
 0x1aa   : > { %v1680_v38 = vpop.f32.mrf.mxu1 }
 0x1ab   : > { %v1681_v40 = vadd.f32 %v2638_v37, %v1680_v38 }
 0x1ac   : > { %v1686_v20 = vpop.f32.mrf.mxu3 }
 0x1ad   : > { %v1746_v36 = vmax.f32 %v1681_v40, 0.0  ;;  %v1687_v43 = vadd.f32 %v2638_v37, %v1686_v20 }
 0x1af   : > { %1778 = vst.msk [vmem:[%s2664_s9 + $0x78] sm:$0xff] %vm289_vm1, %v1746_v36  ;;  %v1748_v17 = vmax.f32 %v1687_v43, 0.0 }
 0x1b1   : > { %1780 = vst.msk [vmem:[%s2664_s9 + $0x88] sm:$0xff] %vm289_vm1, %v1748_v17 }
 0x1b4   : > { %v1689_v16 = vpop.f32.mrf.mxu3 }
 0x1b5   : > { %v1690_v11 = vadd.f32 %v2638_v37, %v1689_v16 }
 0x1b7   : > { %v1749_v19 = vmax.f32 %v1690_v11, 0.0 }
 0x1b9   : > { %1781 = vst.msk [vmem:[%s2664_s9 + $0x90] sm:$0xff] %vm289_vm1, %v1749_v19 }
 0x1bc   : > { %v1692_v22 = vpop.f32.mrf.mxu3 }
 0x1bd   : > { %v1693_v58 = vadd.f32 %v2638_v37, %v1692_v22 }
 0x1bf   : > { %v1750_v30 = vmax.f32 %v1693_v58, 0.0 }
 0x1c1   : > { %1782 = vst.msk [vmem:[%s2664_s9 + $0x98] sm:$0xff] %vm289_vm1, %v1750_v30 }
 0x1c4   : > { %v1695_v8 = vpop.f32.mrf.mxu3 }
 0x1c5   : > { %v1696_v41 = vadd.f32 %v2638_v37, %v1695_v8 }
 0x1c7   : > { %v1751_v42 = vmax.f32 %v1696_v41, 0.0 }
 0x1c9   : > { %1783 = vst.msk [vmem:[%s2664_s9 + $0xa0] sm:$0xff] %vm289_vm1, %v1751_v42 }
 0x1cc   : > { %v1698_v33 = vpop.f32.mrf.mxu3 }
 0x1cd   : > { %v1699_v55 = vadd.f32 %v2638_v37, %v1698_v33 }
 0x1cf   : > { %v1752_v61 = vmax.f32 %v1699_v55, 0.0 }
 0x1d1   : > { %1784 = vst.msk [vmem:[%s2664_s9 + $0xa8] sm:$0xff] %vm289_vm1, %v1752_v61 }
 0x1d4   : > { %v1701_v46 = vpop.f32.mrf.mxu3 }
 0x1d5   : > { %v1702_v47 = vadd.f32 %v2638_v37, %v1701_v46 }
 0x1d7   : > { %v1753_v49 = vmax.f32 %v1702_v47, 0.0 }
 0x1d9   : > { %1785 = vst.msk [vmem:[%s2664_s9 + $0xb0] sm:$0xff] %vm289_vm1, %v1753_v49 }
 0x1dc   : > { %v1704_v18 = vpop.f32.mrf.mxu3 }
 0x1dd   : > { %v1705_v10 = vadd.f32 %v2638_v37, %v1704_v18 }
 0x1df   : > { %v1754_v50 = vmax.f32 %v1705_v10, 0.0 }
 0x1e1   : > { %1786 = vst.msk [vmem:[%s2664_s9 + $0xb8] sm:$0xff] %vm289_vm1, %v1754_v50 }
 0x1e4   : > { %v1707_v53 = vpop.f32.mrf.mxu3 }
 0x1e5   : > { %v1708_v52 = vadd.f32 %v2638_v37, %v1707_v53 }
 0x1e7   : > { %v1755_v29 = vmax.f32 %v1708_v52, 0.0 }
 0x1e9   : > { %1787 = vst.msk [vmem:[%s2664_s9 + $0xc0] sm:$0xff] %vm289_vm1, %v1755_v29 }
 0x1ec   : > { %v1710_v56 = vpop.f32.mrf.mxu3 }
 0x1ed   : > { %v1711_v60 = vadd.f32 %v2638_v37, %v1710_v56 }
 0x1ef   : > { %v1756_v31 = vmax.f32 %v1711_v60, 0.0 }
 0x1f1   : > { %1788 = vst.msk [vmem:[%s2664_s9 + $0xc8] sm:$0xff] %vm289_vm1, %v1756_v31 }
 0x1f4   : > { %v1713_v1 = vpop.f32.mrf.mxu3 }
 0x1f5   : > { %v1714_v0 = vadd.f32 %v2638_v37, %v1713_v1 }
 0x1f7   : > { %v1757_v21 = vmax.f32 %v1714_v0, 0.0 }
 0x1f9   : > { %1789 = vst.msk [vmem:[%s2664_s9 + $0xd0] sm:$0xff] %vm289_vm1, %v1757_v21 }
 0x1fc   : > { %v1716_v45 = vpop.f32.mrf.mxu3 }
 0x1fd   : > { %v1717_v3 = vadd.f32 %v2638_v37, %v1716_v45 }
 0x1ff   : > { %v1758_v5 = vmax.f32 %v1717_v3, 0.0 }
 0x201   : > { %1790 = vst.msk [vmem:[%s2664_s9 + $0xd8] sm:$0xff] %vm289_vm1, %v1758_v5 }
 0x204   : > { %v1719_v2 = vpop.f32.mrf.mxu3 }
 0x205   : > { %v1720_v44 = vadd.f32 %v2638_v37, %v1719_v2 }
 0x207   : > { %v1759_v4 = vmax.f32 %v1720_v44, 0.0 }
 0x209   : > { %1791 = vst.msk [vmem:[%s2664_s9 + $0xe0] sm:$0xff] %vm289_vm1, %v1759_v4 }
 0x20c   : > { %v1722_v6 = vpop.f32.mrf.mxu3 }
 0x20d   : > { %v1723_v48 = vadd.f32 %v2638_v37, %v1722_v6 }
 0x20f   : > { %v1760_v9 = vmax.f32 %v1723_v48, 0.0 }
 0x211   : > { %1792 = vst.msk [vmem:[%s2664_s9 + $0xe8] sm:$0xff] %vm289_vm1, %v1760_v9 }
 0x214   : > { %v1725_v14 = vpop.f32.mrf.mxu3 }
 0x215   : > { %v1726_v12 = vadd.f32 %v2638_v37, %v1725_v14 }
 0x217   : > { %v1761_v25 = vmax.f32 %v1726_v12, 0.0 }
 0x219   : > { %1793 = vst.msk [vmem:[%s2664_s9 + $0xf0] sm:$0xff] %vm289_vm1, %v1761_v25 }
 0x21c   : > { %v1728_v26 = vpop.f32.mrf.mxu3 }
 0x21d   : > { %v1729_v54 = vadd.f32 %v2638_v37, %v1728_v26 }
 0x21f   : > { %v1762_v13 = vmax.f32 %v1729_v54, 0.0 }
 0x221   : > { %1794 = vst.msk [vmem:[%s2664_s9 + $0xf8] sm:$0xff] %vm289_vm1, %v1762_v13 }
 0x222 PF: > { %s16_s21 = sadd.s32 1, %s1967_s21  }
 0x223   : > { %p13_p4 = scmp.ge.s32.totalorder %s16_s21, 4  }
 0x225   :  { %15 = sbr.rel (!%p13_p4) target bundleno = 1 (0x1), region = 77 }

</bundles_post_ra>
